<compile_context>
chip_gen: v7x
topology: tpu7x:2x2x1
jax: 0.10.0
libtpu: 0.0.40
codegen_flags: <defaults>
</compile_context>

<pallas_src>
import functools
import math

import jax
import jax.numpy as jnp
from jax import lax
from jax.experimental import pallas as pl
from jax.experimental.pallas import tpu as pltpu

_VMEM_LIMIT = 32 * 1024 * 1024  # conservative: fits scoped VMEM on v5e/v6e/v7x


# ------------------------- Fused MHA kernel -------------------------

def _mha_kernel(xq_ref, xkv_ref, m_ref, wq_ref, bq_ref, wkv_ref, bkv_ref,
                wo_ref, bo_ref, o_ref, *, num_heads):
    # Per batch element:
    #   xq  [Tq, D] bf16, xkv [Tk, D] bf16, mask [Tq, Tk] f32 (1 keep / 0 mask)
    #   wq [D, D] bf16, wkv [D, 2D] bf16, wo [D, D] bf16, biases f32 [1, N]
    D = xq_ref.shape[-1]
    Dh = D // num_heads
    scale = 1.0 / math.sqrt(Dh)

    xq = xq_ref[...]
    xkv = xkv_ref[...]
    mask = m_ref[...]

    # Projections: bf16 operands, f32 MXU accumulation, bias fused in epilogue.
    q = jnp.dot(xq, wq_ref[...], preferred_element_type=jnp.float32) + bq_ref[...]
    kv = jnp.dot(xkv, wkv_ref[...], preferred_element_type=jnp.float32) + bkv_ref[...]

    q = q.astype(jnp.bfloat16)
    k = kv[:, :D].astype(jnp.bfloat16)
    v = kv[:, D:].astype(jnp.bfloat16)

    head_outs = []
    for h in range(num_heads):            # static unroll over heads
        lo, hi = h * Dh, (h + 1) * Dh
        qh = q[:, lo:hi]
        kh = k[:, lo:hi]
        vh = v[:, lo:hi]
        # scores: contract last dims directly (no transpose of K).
        s = lax.dot_general(qh, kh, (((1,), (1,)), ((), ())),
                            preferred_element_type=jnp.float32) * scale
        s = jnp.where(mask > 0.0, s, -1e9)
        s = s - jnp.max(s, axis=-1, keepdims=True)
        p = jnp.exp(s)
        p = p * pl.reciprocal(jnp.sum(p, axis=-1, keepdims=True), approx=True)
        head_outs.append(
            jnp.dot(p.astype(jnp.bfloat16), vh,
                    preferred_element_type=jnp.float32))
    attn = jnp.concatenate(head_outs, axis=-1).astype(jnp.bfloat16)   # [Tq, D]
    out = jnp.dot(attn, wo_ref[...], preferred_element_type=jnp.float32) + bo_ref[...]
    o_ref[...] = out.astype(o_ref.dtype)                               # lane-dense [Tq, D]


def fused_mha(x_q, x_kv, mask, p, num_heads):
    # x_q [B, Tq, D] bf16, x_kv [B, Tk, D] bf16, mask [B, 1, Tq, Tk] f32
    B, Tq, D = x_q.shape
    Tk = x_kv.shape[1]

    flops = 2 * B * (Tq * D * D + Tk * D * 2 * D + 2 * Tq * Tk * D + Tq * D * D)
    transc = B * num_heads * Tq * Tk
    ins = (x_q, x_kv, mask, p["wq"], p["bq"], p["wkv"], p["bkv"], p["wo"], p["bo"])
    bytes_accessed = sum(int(a.size) * a.dtype.itemsize for a in ins) + B * Tq * D * 2

    kernel = functools.partial(_mha_kernel, num_heads=num_heads)
    return pl.pallas_call(
        kernel,
        out_shape=jax.ShapeDtypeStruct((B, Tq, D), jnp.bfloat16),
        grid=(B,),
        in_specs=[
            pl.BlockSpec((None, Tq, D), lambda b: (b, 0, 0)),
            pl.BlockSpec((None, Tk, D), lambda b: (b, 0, 0)),
            pl.BlockSpec((None, None, Tq, Tk), lambda b: (b, 0, 0, 0)),
            pl.BlockSpec((D, D), lambda b: (0, 0)),        # wq
            pl.BlockSpec((1, D), lambda b: (0, 0)),        # bq
            pl.BlockSpec((D, 2 * D), lambda b: (0, 0)),    # wkv (K|V fused)
            pl.BlockSpec((1, 2 * D), lambda b: (0, 0)),    # bkv
            pl.BlockSpec((D, D), lambda b: (0, 0)),        # wo
            pl.BlockSpec((1, D), lambda b: (0, 0)),        # bo
        ],
        out_specs=pl.BlockSpec((None, Tq, D), lambda b: (b, 0, 0)),
        compiler_params=pltpu.CompilerParams(
            dimension_semantics=("parallel",),
            vmem_limit_bytes=_VMEM_LIMIT),
        cost_estimate=pl.CostEstimate(
            flops=int(flops), transcendentals=int(transc),
            bytes_accessed=int(bytes_accessed)),
    )(x_q, x_kv, mask, p["wq"], p["bq"], p["wkv"], p["bkv"], p["wo"], p["bo"])


# ------------------------- Fused FFN kernel -------------------------

def _ffn_kernel(x_ref, w1_ref, b1_ref, w2_ref, b2_ref, o_ref):
    # Fused Linear -> ReLU -> Linear on one [tm, D] tile.
    h = jnp.dot(x_ref[...], w1_ref[...], preferred_element_type=jnp.float32) + b1_ref[...]
    h = jnp.maximum(h, 0.0).astype(jnp.bfloat16)
    out = jnp.dot(h, w2_ref[...], preferred_element_type=jnp.float32) + b2_ref[...]
    o_ref[...] = out.astype(o_ref.dtype)


def _pick_m_tile(m, max_tile=512):
    if m <= max_tile:
        return m
    t = (max_tile // 8) * 8
    while t >= 8:
        if m % t == 0:
            return t
        t -= 8
    return m


def fused_ffn(x2d, p):
    # x2d [M, D] bf16 -> [M, D] f32
    M, D = x2d.shape
    Dff = p["w1"].shape[1]
    tm = _pick_m_tile(M)

    flops = 4 * M * D * Dff
    ins = (x2d, p["w1"], p["b1"], p["w2"], p["b2"])
    bytes_accessed = sum(int(a.size) * a.dtype.itemsize for a in ins) + M * D * 4

    return pl.pallas_call(
        _ffn_kernel,
        out_shape=jax.ShapeDtypeStruct((M, D), jnp.float32),
        grid=(M // tm,),
        in_specs=[
            pl.BlockSpec((tm, D), lambda i: (i, 0)),
            pl.BlockSpec((D, Dff), lambda i: (0, 0)),
            pl.BlockSpec((1, Dff), lambda i: (0, 0)),
            pl.BlockSpec((Dff, D), lambda i: (0, 0)),
            pl.BlockSpec((1, D), lambda i: (0, 0)),
        ],
        out_specs=pl.BlockSpec((tm, D), lambda i: (i, 0)),
        compiler_params=pltpu.CompilerParams(
            dimension_semantics=("parallel",),
            vmem_limit_bytes=_VMEM_LIMIT),
        cost_estimate=pl.CostEstimate(
            flops=int(flops), transcendentals=0,
            bytes_accessed=int(bytes_accessed)),
    )(x2d, p["w1"], p["b1"], p["w2"], p["b2"])


# ------------------------- Decoder layer (host glue) -------------------------

@functools.partial(jax.jit, static_argnames=("num_heads",))
def decoder_layer(params, tgt, tgt_mask, src, src_mask, *, num_heads):
    tgt_b = tgt.astype(jnp.bfloat16)
    src_b = src.astype(jnp.bfloat16)
    x = fused_mha(tgt_b, tgt_b, tgt_mask, params["self_attn"], num_heads)   # self-attn
    x = fused_mha(x, src_b, src_mask, params["src_attn"], num_heads)        # cross-attn
    B, T, D = x.shape
    out = fused_ffn(x.reshape(B * T, D), params["ffn"])                     # FFN
    return out.reshape(B, T, D)


# ------------------------- Pure-JAX reference (same precision policy) -------------------------

def _ref_mha(x_q, x_kv, mask, p, num_heads):
    D = x_q.shape[-1]
    Dh = D // num_heads
    B, Tq, _ = x_q.shape
    Tk = x_kv.shape[1]
    q = jnp.dot(x_q, p["wq"], preferred_element_type=jnp.float32) + p["bq"]
    kv = jnp.dot(x_kv, p["wkv"], preferred_element_type=jnp.float32) + p["bkv"]
    q = q.astype(jnp.bfloat16)
    k = kv[..., :D].astype(jnp.bfloat16)
    v = kv[..., D:].astype(jnp.bfloat16)
    qh = q.reshape(B, Tq, num_heads, Dh).transpose(0, 2, 1, 3)
    kh = k.reshape(B, Tk, num_heads, Dh).transpose(0, 2, 1, 3)
    vh = v.reshape(B, Tk, num_heads, Dh).transpose(0, 2, 1, 3)
    s = jnp.einsum("bhqd,bhkd->bhqk", qh, kh,
                   preferred_element_type=jnp.float32) / math.sqrt(Dh)
    s = jnp.where(mask > 0.0, s, -1e9)
    s = s - jnp.max(s, axis=-1, keepdims=True)
    pm = jnp.exp(s)
    pm = pm / jnp.sum(pm, axis=-1, keepdims=True)
    o = jnp.einsum("bhqk,bhkd->bhqd", pm.astype(jnp.bfloat16), vh,
                   preferred_element_type=jnp.float32)
    o = o.transpose(0, 2, 1, 3).reshape(B, Tq, D).astype(jnp.bfloat16)
    out = jnp.dot(o, p["wo"], preferred_element_type=jnp.float32) + p["bo"]
    return out.astype(jnp.bfloat16)


def _ref_ffn(x2d, p):
    h = jnp.dot(x2d, p["w1"], preferred_element_type=jnp.float32) + p["b1"]
    h = jnp.maximum(h, 0.0).astype(jnp.bfloat16)
    return jnp.dot(h, p["w2"], preferred_element_type=jnp.float32) + p["b2"]


def _ref_decoder(params, tgt, tgt_mask, src, src_mask, num_heads):
    tgt_b = tgt.astype(jnp.bfloat16)
    src_b = src.astype(jnp.bfloat16)
    x = _ref_mha(tgt_b, tgt_b, tgt_mask, params["self_attn"], num_heads)
    x = _ref_mha(x, src_b, src_mask, params["src_attn"], num_heads)
    B, T, D = x.shape
    return _ref_ffn(x.reshape(B * T, D), params["ffn"]).reshape(B, T, D)


# ------------------------- Params -------------------------

def _init_raw_params(key, d_model, d_ff):
    def lin(k, fan_in, fan_out):
        kw, kb = jax.random.split(k)
        w = jax.random.normal(kw, (fan_in, fan_out), jnp.float32) * 0.05
        b = jax.random.normal(kb, (fan_out,), jnp.float32) * 0.05
        return w, b

    keys = jax.random.split(key, 10)
    raw = {"self_attn": {}, "src_attn": {}, "ffn": {}}
    for i, name in enumerate(["wq", "wk", "wv", "wo"]):
        w, b = lin(keys[i], d_model, d_model)
        raw["self_attn"][name] = w
        raw["self_attn"]["b" + name[1]] = b
    for i, name in enumerate(["wq", "wk", "wv", "wo"]):
        w, b = lin(keys[4 + i], d_model, d_model)
        raw["src_attn"][name] = w
        raw["src_attn"]["b" + name[1]] = b
    w1, b1 = lin(keys[8], d_model, d_ff)
    w2, b2 = lin(keys[9], d_ff, d_model)
    raw["ffn"] = {"w1": w1, "b1": b1, "w2": w2, "b2": b2}
    return raw


def _prepare_params(raw):
    # bf16 weights for the MXU; K/V projection weights fused into [D, 2D];
    # biases kept in f32 with shape [1, N] (fused into the matmul epilogue).
    def attn(p):
        return dict(
            wq=p["wq"].astype(jnp.bfloat16),
            bq=p["bq"].reshape(1, -1).astype(jnp.float32),
            wkv=jnp.concatenate([p["wk"], p["wv"]], axis=1).astype(jnp.bfloat16),
            bkv=jnp.concatenate([p["bk"], p["bv"]]).reshape(1, -1).astype(jnp.float32),
            wo=p["wo"].astype(jnp.bfloat16),
            bo=p["bo"].reshape(1, -1).astype(jnp.float32),
        )

    return dict(
        self_attn=attn(raw["self_attn"]),
        src_attn=attn(raw["src_attn"]),
        ffn=dict(
            w1=raw["ffn"]["w1"].astype(jnp.bfloat16),
            b1=raw["ffn"]["b1"].reshape(1, -1).astype(jnp.float32),
            w2=raw["ffn"]["w2"].astype(jnp.bfloat16),
            b2=raw["ffn"]["b2"].reshape(1, -1).astype(jnp.float32),
        ),
    )


# ------------------------- Setup & run -------------------------

if __name__ == "__main__":
    B, T_tgt, T_src = 2, 8, 8
    d_model, num_heads, d_ff = 32, 4, 64

    key = jax.random.PRNGKey(0)
    k_tgt, k_src, k_par = jax.random.split(key, 3)

    tgt = jax.random.normal(k_tgt, (B, T_tgt, d_model), jnp.float32)
    src = jax.random.normal(k_src, (B, T_src, d_model), jnp.float32)

    # Causal self-attention mask [B, 1, T_tgt, T_tgt]; cross mask [B, 1, T_tgt, T_src].
    tgt_mask = jnp.broadcast_to(
        jnp.tril(jnp.ones((T_tgt, T_tgt), jnp.float32)), (B, 1, T_tgt, T_tgt))
    src_mask = jnp.ones((B, 1, T_tgt, T_src), jnp.float32)
    src_mask = src_mask.at[1, :, :, -1].set(0.0)   # mask last src token for batch 1

    params = _prepare_params(_init_raw_params(k_par, d_model, d_ff))

    out = decoder_layer(params, tgt, tgt_mask, src, src_mask, num_heads=num_heads)
    out = jax.block_until_ready(out)

    ref = _ref_decoder(params, tgt, tgt_mask, src, src_mask, num_heads)
    assert out.shape == (B, T_tgt, d_model)
    assert jnp.allclose(out, ref, rtol=2e-2, atol=2e-2), "mismatch vs reference"

    print("KERNEL_OK")
</pallas_src>

<mosaic_0001>
module attributes {stable_mosaic.version = 11 : i64} {
  func.func @_mha_kernel(%arg0: i32, %arg1: memref<1x8x32xbf16, #tpu.memory_space<vmem>>, %arg2: memref<1x8x32xbf16, #tpu.memory_space<vmem>>, %arg3: memref<1x1x8x8xf32, #tpu.memory_space<vmem>>, %arg4: memref<32x32xbf16, #tpu.memory_space<vmem>>, %arg5: memref<1x32xf32, #tpu.memory_space<vmem>>, %arg6: memref<32x64xbf16, #tpu.memory_space<vmem>>, %arg7: memref<1x64xf32, #tpu.memory_space<vmem>>, %arg8: memref<32x32xbf16, #tpu.memory_space<vmem>>, %arg9: memref<1x32xf32, #tpu.memory_space<vmem>>, %arg10: memref<1x8x32xbf16, #tpu.memory_space<vmem>>) attributes {dimension_semantics = [#tpu.dimension_semantics<parallel>], iteration_bounds = array<i64: 2>, scalar_prefetch = 0 : i64, scratch_operands = 0 : i64, tpu.core_type = #tpu.core_type<tc>, window_params = [{transform_indices = @transform_0, window_bounds = array<i64: 1, 8, 32>}, {transform_indices = @transform_1, window_bounds = array<i64: 1, 8, 32>}, {transform_indices = @transform_2, window_bounds = array<i64: 1, 1, 8, 8>}, {pipeline_mode = #tpu.pipeline_mode<synchronous>, transform_indices = @transform_3, window_bounds = array<i64: 32, 32>}, {pipeline_mode = #tpu.pipeline_mode<synchronous>, transform_indices = @transform_4, window_bounds = array<i64: 1, 32>}, {pipeline_mode = #tpu.pipeline_mode<synchronous>, transform_indices = @transform_5, window_bounds = array<i64: 32, 64>}, {pipeline_mode = #tpu.pipeline_mode<synchronous>, transform_indices = @transform_6, window_bounds = array<i64: 1, 64>}, {pipeline_mode = #tpu.pipeline_mode<synchronous>, transform_indices = @transform_7, window_bounds = array<i64: 32, 32>}, {pipeline_mode = #tpu.pipeline_mode<synchronous>, transform_indices = @transform_8, window_bounds = array<i64: 1, 32>}, {transform_indices = @transform_9, window_bounds = array<i64: 1, 8, 32>}]} {
    %c0 = arith.constant 0 : index
    %c0_0 = arith.constant 0 : index
    %c0_1 = arith.constant 0 : index
    %0 = vector.load %arg1[%c0, %c0_0, %c0_1] : memref<1x8x32xbf16, #tpu.memory_space<vmem>>, vector<1x8x32xbf16>
    %1 = vector.shape_cast %0 : vector<1x8x32xbf16> to vector<8x32xbf16>
    %c0_2 = arith.constant 0 : index
    %c0_3 = arith.constant 0 : index
    %c0_4 = arith.constant 0 : index
    %2 = vector.load %arg2[%c0_2, %c0_3, %c0_4] : memref<1x8x32xbf16, #tpu.memory_space<vmem>>, vector<1x8x32xbf16>
    %3 = vector.shape_cast %2 : vector<1x8x32xbf16> to vector<8x32xbf16>
    %c0_5 = arith.constant 0 : index
    %c0_6 = arith.constant 0 : index
    %c0_7 = arith.constant 0 : index
    %c0_8 = arith.constant 0 : index
    %4 = vector.load %arg3[%c0_5, %c0_6, %c0_7, %c0_8] : memref<1x1x8x8xf32, #tpu.memory_space<vmem>>, vector<1x1x8x8xf32>
    %5 = vector.shape_cast %4 : vector<1x1x8x8xf32> to vector<8x8xf32>
    %c0_9 = arith.constant 0 : index
    %c0_10 = arith.constant 0 : index
    %6 = vector.load %arg4[%c0_9, %c0_10] : memref<32x32xbf16, #tpu.memory_space<vmem>>, vector<32x32xbf16>
    %cst = arith.constant dense<0.000000e+00> : vector<8x32xf32>
    %7 = tpu.matmul %1, %6, %cst {dimension_numbers = #tpu.dot_dimension_numbers<[1], [0], [0], [1], [0, 0, 1, 1], [], []>} : vector<8x32xbf16>, vector<32x32xbf16>, vector<8x32xf32> -> vector<8x32xf32>
    %c0_11 = arith.constant 0 : index
    %c0_12 = arith.constant 0 : index
    %8 = vector.load %arg5[%c0_11, %c0_12] : memref<1x32xf32, #tpu.memory_space<vmem>>, vector<1x32xf32>
    %9 = vector.broadcast %8 : vector<1x32xf32> to vector<8x32xf32>
    %10 = arith.addf %7, %9 : vector<8x32xf32>
    %c0_13 = arith.constant 0 : index
    %c0_14 = arith.constant 0 : index
    %11 = vector.load %arg6[%c0_13, %c0_14] : memref<32x64xbf16, #tpu.memory_space<vmem>>, vector<32x64xbf16>
    %cst_15 = arith.constant dense<0.000000e+00> : vector<8x64xf32>
    %12 = tpu.matmul %3, %11, %cst_15 {dimension_numbers = #tpu.dot_dimension_numbers<[1], [0], [0], [1], [0, 0, 1, 1], [], []>} : vector<8x32xbf16>, vector<32x64xbf16>, vector<8x64xf32> -> vector<8x64xf32>
    %c0_16 = arith.constant 0 : index
    %c0_17 = arith.constant 0 : index
    %13 = vector.load %arg7[%c0_16, %c0_17] : memref<1x64xf32, #tpu.memory_space<vmem>>, vector<1x64xf32>
    %14 = vector.broadcast %13 : vector<1x64xf32> to vector<8x64xf32>
    %15 = arith.addf %12, %14 : vector<8x64xf32>
    %16 = arith.truncf %10 : vector<8x32xf32> to vector<8x32xbf16>
    %17 = vector.extract_strided_slice %15 {offsets = [0, 0], sizes = [8, 32], strides = [1, 1]} : vector<8x64xf32> to vector<8x32xf32>
    %18 = arith.truncf %17 : vector<8x32xf32> to vector<8x32xbf16>
    %19 = vector.extract_strided_slice %15 {offsets = [0, 32], sizes = [8, 32], strides = [1, 1]} : vector<8x64xf32> to vector<8x32xf32>
    %20 = arith.truncf %19 : vector<8x32xf32> to vector<8x32xbf16>
    %21 = vector.extract_strided_slice %16 {offsets = [0, 0], sizes = [8, 8], strides = [1, 1]} : vector<8x32xbf16> to vector<8x8xbf16>
    %22 = vector.extract_strided_slice %18 {offsets = [0, 0], sizes = [8, 8], strides = [1, 1]} : vector<8x32xbf16> to vector<8x8xbf16>
    %23 = vector.extract_strided_slice %20 {offsets = [0, 0], sizes = [8, 8], strides = [1, 1]} : vector<8x32xbf16> to vector<8x8xbf16>
    %cst_18 = arith.constant dense<0.000000e+00> : vector<8x8xf32>
    %24 = tpu.matmul %21, %22, %cst_18 {dimension_numbers = #tpu.dot_dimension_numbers<[1], [1], [0], [0], [0, 0, 1, 0], [], []>} : vector<8x8xbf16>, vector<8x8xbf16>, vector<8x8xf32> -> vector<8x8xf32>
    %cst_19 = arith.constant 0.353553385 : f32
    %25 = vector.broadcast %cst_19 : f32 to vector<8x8xf32>
    %26 = arith.mulf %24, %25 : vector<8x8xf32>
    %cst_20 = arith.constant 0.000000e+00 : f32
    %27 = vector.broadcast %cst_20 : f32 to vector<8x8xf32>
    %28 = arith.cmpf ogt, %5, %27 : vector<8x8xf32>
    %cst_21 = arith.constant -1.000000e+09 : f32
    %29 = vector.broadcast %cst_21 : f32 to vector<8x8xf32>
    %30 = arith.select %28, %26, %29 : vector<8x8xi1>, vector<8x8xf32>
    %cst_22 = arith.constant dense<0xFF800000> : vector<8xf32>
    %31 = vector.multi_reduction <maximumf>, %30, %cst_22 [1] : vector<8x8xf32> to vector<8xf32>
    %32 = vector.shape_cast %31 : vector<8xf32> to vector<8x1xf32>
    %33 = vector.broadcast %32 : vector<8x1xf32> to vector<8x8xf32>
    %34 = arith.subf %30, %33 : vector<8x8xf32>
    %35 = math.exp %34 : vector<8x8xf32>
    %cst_23 = arith.constant dense<0.000000e+00> : vector<8xf32>
    %36 = vector.multi_reduction <add>, %35, %cst_23 [1] : vector<8x8xf32> to vector<8xf32>
    %37 = vector.shape_cast %36 : vector<8xf32> to vector<8x1xf32>
    %38 = tpu.reciprocal %37 {approx = true} : vector<8x1xf32> -> vector<8x1xf32>
    %39 = vector.broadcast %38 : vector<8x1xf32> to vector<8x8xf32>
    %40 = arith.mulf %35, %39 : vector<8x8xf32>
    %41 = arith.truncf %40 : vector<8x8xf32> to vector<8x8xbf16>
    %cst_24 = arith.constant dense<0.000000e+00> : vector<8x8xf32>
    %42 = tpu.matmul %41, %23, %cst_24 {dimension_numbers = #tpu.dot_dimension_numbers<[1], [0], [0], [1], [0, 0, 1, 1], [], []>} : vector<8x8xbf16>, vector<8x8xbf16>, vector<8x8xf32> -> vector<8x8xf32>
    %43 = vector.extract_strided_slice %16 {offsets = [0, 8], sizes = [8, 8], strides = [1, 1]} : vector<8x32xbf16> to vector<8x8xbf16>
    %44 = vector.extract_strided_slice %18 {offsets = [0, 8], sizes = [8, 8], strides = [1, 1]} : vector<8x32xbf16> to vector<8x8xbf16>
    %45 = vector.extract_strided_slice %20 {offsets = [0, 8], sizes = [8, 8], strides = [1, 1]} : vector<8x32xbf16> to vector<8x8xbf16>
    %cst_25 = arith.constant dense<0.000000e+00> : vector<8x8xf32>
    %46 = tpu.matmul %43, %44, %cst_25 {dimension_numbers = #tpu.dot_dimension_numbers<[1], [1], [0], [0], [0, 0, 1, 0], [], []>} : vector<8x8xbf16>, vector<8x8xbf16>, vector<8x8xf32> -> vector<8x8xf32>
    %cst_26 = arith.constant 0.353553385 : f32
    %47 = vector.broadcast %cst_26 : f32 to vector<8x8xf32>
    %48 = arith.mulf %46, %47 : vector<8x8xf32>
    %cst_27 = arith.constant 0.000000e+00 : f32
    %49 = vector.broadcast %cst_27 : f32 to vector<8x8xf32>
    %50 = arith.cmpf ogt, %5, %49 : vector<8x8xf32>
    %cst_28 = arith.constant -1.000000e+09 : f32
    %51 = vector.broadcast %cst_28 : f32 to vector<8x8xf32>
    %52 = arith.select %50, %48, %51 : vector<8x8xi1>, vector<8x8xf32>
    %cst_29 = arith.constant dense<0xFF800000> : vector<8xf32>
    %53 = vector.multi_reduction <maximumf>, %52, %cst_29 [1] : vector<8x8xf32> to vector<8xf32>
    %54 = vector.shape_cast %53 : vector<8xf32> to vector<8x1xf32>
    %55 = vector.broadcast %54 : vector<8x1xf32> to vector<8x8xf32>
    %56 = arith.subf %52, %55 : vector<8x8xf32>
    %57 = math.exp %56 : vector<8x8xf32>
    %cst_30 = arith.constant dense<0.000000e+00> : vector<8xf32>
    %58 = vector.multi_reduction <add>, %57, %cst_30 [1] : vector<8x8xf32> to vector<8xf32>
    %59 = vector.shape_cast %58 : vector<8xf32> to vector<8x1xf32>
    %60 = tpu.reciprocal %59 {approx = true} : vector<8x1xf32> -> vector<8x1xf32>
    %61 = vector.broadcast %60 : vector<8x1xf32> to vector<8x8xf32>
    %62 = arith.mulf %57, %61 : vector<8x8xf32>
    %63 = arith.truncf %62 : vector<8x8xf32> to vector<8x8xbf16>
    %cst_31 = arith.constant dense<0.000000e+00> : vector<8x8xf32>
    %64 = tpu.matmul %63, %45, %cst_31 {dimension_numbers = #tpu.dot_dimension_numbers<[1], [0], [0], [1], [0, 0, 1, 1], [], []>} : vector<8x8xbf16>, vector<8x8xbf16>, vector<8x8xf32> -> vector<8x8xf32>
    %65 = vector.extract_strided_slice %16 {offsets = [0, 16], sizes = [8, 8], strides = [1, 1]} : vector<8x32xbf16> to vector<8x8xbf16>
    %66 = vector.extract_strided_slice %18 {offsets = [0, 16], sizes = [8, 8], strides = [1, 1]} : vector<8x32xbf16> to vector<8x8xbf16>
    %67 = vector.extract_strided_slice %20 {offsets = [0, 16], sizes = [8, 8], strides = [1, 1]} : vector<8x32xbf16> to vector<8x8xbf16>
    %cst_32 = arith.constant dense<0.000000e+00> : vector<8x8xf32>
    %68 = tpu.matmul %65, %66, %cst_32 {dimension_numbers = #tpu.dot_dimension_numbers<[1], [1], [0], [0], [0, 0, 1, 0], [], []>} : vector<8x8xbf16>, vector<8x8xbf16>, vector<8x8xf32> -> vector<8x8xf32>
    %cst_33 = arith.constant 0.353553385 : f32
    %69 = vector.broadcast %cst_33 : f32 to vector<8x8xf32>
    %70 = arith.mulf %68, %69 : vector<8x8xf32>
    %cst_34 = arith.constant 0.000000e+00 : f32
    %71 = vector.broadcast %cst_34 : f32 to vector<8x8xf32>
    %72 = arith.cmpf ogt, %5, %71 : vector<8x8xf32>
    %cst_35 = arith.constant -1.000000e+09 : f32
    %73 = vector.broadcast %cst_35 : f32 to vector<8x8xf32>
    %74 = arith.select %72, %70, %73 : vector<8x8xi1>, vector<8x8xf32>
    %cst_36 = arith.constant dense<0xFF800000> : vector<8xf32>
    %75 = vector.multi_reduction <maximumf>, %74, %cst_36 [1] : vector<8x8xf32> to vector<8xf32>
    %76 = vector.shape_cast %75 : vector<8xf32> to vector<8x1xf32>
    %77 = vector.broadcast %76 : vector<8x1xf32> to vector<8x8xf32>
    %78 = arith.subf %74, %77 : vector<8x8xf32>
    %79 = math.exp %78 : vector<8x8xf32>
    %cst_37 = arith.constant dense<0.000000e+00> : vector<8xf32>
    %80 = vector.multi_reduction <add>, %79, %cst_37 [1] : vector<8x8xf32> to vector<8xf32>
    %81 = vector.shape_cast %80 : vector<8xf32> to vector<8x1xf32>
    %82 = tpu.reciprocal %81 {approx = true} : vector<8x1xf32> -> vector<8x1xf32>
    %83 = vector.broadcast %82 : vector<8x1xf32> to vector<8x8xf32>
    %84 = arith.mulf %79, %83 : vector<8x8xf32>
    %85 = arith.truncf %84 : vector<8x8xf32> to vector<8x8xbf16>
    %cst_38 = arith.constant dense<0.000000e+00> : vector<8x8xf32>
    %86 = tpu.matmul %85, %67, %cst_38 {dimension_numbers = #tpu.dot_dimension_numbers<[1], [0], [0], [1], [0, 0, 1, 1], [], []>} : vector<8x8xbf16>, vector<8x8xbf16>, vector<8x8xf32> -> vector<8x8xf32>
    %87 = vector.extract_strided_slice %16 {offsets = [0, 24], sizes = [8, 8], strides = [1, 1]} : vector<8x32xbf16> to vector<8x8xbf16>
    %88 = vector.extract_strided_slice %18 {offsets = [0, 24], sizes = [8, 8], strides = [1, 1]} : vector<8x32xbf16> to vector<8x8xbf16>
    %89 = vector.extract_strided_slice %20 {offsets = [0, 24], sizes = [8, 8], strides = [1, 1]} : vector<8x32xbf16> to vector<8x8xbf16>
    %cst_39 = arith.constant dense<0.000000e+00> : vector<8x8xf32>
    %90 = tpu.matmul %87, %88, %cst_39 {dimension_numbers = #tpu.dot_dimension_numbers<[1], [1], [0], [0], [0, 0, 1, 0], [], []>} : vector<8x8xbf16>, vector<8x8xbf16>, vector<8x8xf32> -> vector<8x8xf32>
    %cst_40 = arith.constant 0.353553385 : f32
    %91 = vector.broadcast %cst_40 : f32 to vector<8x8xf32>
    %92 = arith.mulf %90, %91 : vector<8x8xf32>
    %cst_41 = arith.constant 0.000000e+00 : f32
    %93 = vector.broadcast %cst_41 : f32 to vector<8x8xf32>
    %94 = arith.cmpf ogt, %5, %93 : vector<8x8xf32>
    %cst_42 = arith.constant -1.000000e+09 : f32
    %95 = vector.broadcast %cst_42 : f32 to vector<8x8xf32>
    %96 = arith.select %94, %92, %95 : vector<8x8xi1>, vector<8x8xf32>
    %cst_43 = arith.constant dense<0xFF800000> : vector<8xf32>
    %97 = vector.multi_reduction <maximumf>, %96, %cst_43 [1] : vector<8x8xf32> to vector<8xf32>
    %98 = vector.shape_cast %97 : vector<8xf32> to vector<8x1xf32>
    %99 = vector.broadcast %98 : vector<8x1xf32> to vector<8x8xf32>
    %100 = arith.subf %96, %99 : vector<8x8xf32>
    %101 = math.exp %100 : vector<8x8xf32>
    %cst_44 = arith.constant dense<0.000000e+00> : vector<8xf32>
    %102 = vector.multi_reduction <add>, %101, %cst_44 [1] : vector<8x8xf32> to vector<8xf32>
    %103 = vector.shape_cast %102 : vector<8xf32> to vector<8x1xf32>
    %104 = tpu.reciprocal %103 {approx = true} : vector<8x1xf32> -> vector<8x1xf32>
    %105 = vector.broadcast %104 : vector<8x1xf32> to vector<8x8xf32>
    %106 = arith.mulf %101, %105 : vector<8x8xf32>
    %107 = arith.truncf %106 : vector<8x8xf32> to vector<8x8xbf16>
    %cst_45 = arith.constant dense<0.000000e+00> : vector<8x8xf32>
    %108 = tpu.matmul %107, %89, %cst_45 {dimension_numbers = #tpu.dot_dimension_numbers<[1], [0], [0], [1], [0, 0, 1, 1], [], []>} : vector<8x8xbf16>, vector<8x8xbf16>, vector<8x8xf32> -> vector<8x8xf32>
    %109 = tpu.concatenate %42, %64, %86, %108 in 1 : vector<8x8xf32>, vector<8x8xf32>, vector<8x8xf32>, vector<8x8xf32> -> vector<8x32xf32>
    %110 = arith.truncf %109 : vector<8x32xf32> to vector<8x32xbf16>
    %c0_46 = arith.constant 0 : index
    %c0_47 = arith.constant 0 : index
    %111 = vector.load %arg8[%c0_46, %c0_47] : memref<32x32xbf16, #tpu.memory_space<vmem>>, vector<32x32xbf16>
    %cst_48 = arith.constant dense<0.000000e+00> : vector<8x32xf32>
    %112 = tpu.matmul %110, %111, %cst_48 {dimension_numbers = #tpu.dot_dimension_numbers<[1], [0], [0], [1], [0, 0, 1, 1], [], []>} : vector<8x32xbf16>, vector<32x32xbf16>, vector<8x32xf32> -> vector<8x32xf32>
    %c0_49 = arith.constant 0 : index
    %c0_50 = arith.constant 0 : index
    %113 = vector.load %arg9[%c0_49, %c0_50] : memref<1x32xf32, #tpu.memory_space<vmem>>, vector<1x32xf32>
    %114 = vector.broadcast %113 : vector<1x32xf32> to vector<8x32xf32>
    %115 = arith.addf %112, %114 : vector<8x32xf32>
    %116 = arith.truncf %115 : vector<8x32xf32> to vector<8x32xbf16>
    %c0_51 = arith.constant 0 : index
    %c0_52 = arith.constant 0 : index
    %c0_53 = arith.constant 0 : index
    %117 = vector.load %arg10[%c0_51, %c0_52, %c0_53] : memref<1x8x32xbf16, #tpu.memory_space<vmem>>, vector<1x8x32xbf16>
    %118 = vector.shape_cast %117 : vector<1x8x32xbf16> to vector<8x32xbf16>
    %119 = vector.shape_cast %116 : vector<8x32xbf16> to vector<1x8x32xbf16>
    tpu.vector_store %arg10[%c0_51, %c0_52, %c0_53], %119 {strides = array<i32>} : memref<1x8x32xbf16, #tpu.memory_space<vmem>>, vector<1x8x32xbf16>,
    return
  }
  func.func @transform_0(%arg0: i32) -> (i32, i32, i32) {
    %c0_i32 = arith.constant 0 : i32
    %c0_i32_0 = arith.constant 0 : i32
    %c0_i32_1 = arith.constant 0 : i32
    return %arg0, %c0_i32, %c0_i32_0 : i32, i32, i32
  }
  func.func @transform_1(%arg0: i32) -> (i32, i32, i32) {
    %c0_i32 = arith.constant 0 : i32
    %c0_i32_0 = arith.constant 0 : i32
    %c0_i32_1 = arith.constant 0 : i32
    return %arg0, %c0_i32, %c0_i32_0 : i32, i32, i32
  }
  func.func @transform_2(%arg0: i32) -> (i32, i32, i32, i32) {
    %c0_i32 = arith.constant 0 : i32
    %c0_i32_0 = arith.constant 0 : i32
    %c0_i32_1 = arith.constant 0 : i32
    %c0_i32_2 = arith.constant 0 : i32
    return %arg0, %c0_i32, %c0_i32_0, %c0_i32_1 : i32, i32, i32, i32
  }
  func.func @transform_3(%arg0: i32) -> (i32, i32) {
    %c0_i32 = arith.constant 0 : i32
    %c0_i32_0 = arith.constant 0 : i32
    %c0_i32_1 = arith.constant 0 : i32
    return %c0_i32, %c0_i32_0 : i32, i32
  }
  func.func @transform_4(%arg0: i32) -> (i32, i32) {
    %c0_i32 = arith.constant 0 : i32
    %c0_i32_0 = arith.constant 0 : i32
    %c0_i32_1 = arith.constant 0 : i32
    return %c0_i32, %c0_i32_0 : i32, i32
  }
  func.func @transform_5(%arg0: i32) -> (i32, i32) {
    %c0_i32 = arith.constant 0 : i32
    %c0_i32_0 = arith.constant 0 : i32
    %c0_i32_1 = arith.constant 0 : i32
    return %c0_i32, %c0_i32_0 : i32, i32
  }
  func.func @transform_6(%arg0: i32) -> (i32, i32) {
    %c0_i32 = arith.constant 0 : i32
    %c0_i32_0 = arith.constant 0 : i32
    %c0_i32_1 = arith.constant 0 : i32
    return %c0_i32, %c0_i32_0 : i32, i32
  }
  func.func @transform_7(%arg0: i32) -> (i32, i32) {
    %c0_i32 = arith.constant 0 : i32
    %c0_i32_0 = arith.constant 0 : i32
    %c0_i32_1 = arith.constant 0 : i32
    return %c0_i32, %c0_i32_0 : i32, i32
  }
  func.func @transform_8(%arg0: i32) -> (i32, i32) {
    %c0_i32 = arith.constant 0 : i32
    %c0_i32_0 = arith.constant 0 : i32
    %c0_i32_1 = arith.constant 0 : i32
    return %c0_i32, %c0_i32_0 : i32, i32
  }
  func.func @transform_9(%arg0: i32) -> (i32, i32, i32) {
    %c0_i32 = arith.constant 0 : i32
    %c0_i32_0 = arith.constant 0 : i32
    %c0_i32_1 = arith.constant 0 : i32
    return %arg0, %c0_i32, %c0_i32_0 : i32, i32, i32
  }
}

module attributes {stable_mosaic.version = 11 : i64} {
  func.func @_mha_kernel(%arg0: i32, %arg1: memref<1x8x32xbf16, #tpu.memory_space<vmem>>, %arg2: memref<1x8x32xbf16, #tpu.memory_space<vmem>>, %arg3: memref<1x1x8x8xf32, #tpu.memory_space<vmem>>, %arg4: memref<32x32xbf16, #tpu.memory_space<vmem>>, %arg5: memref<1x32xf32, #tpu.memory_space<vmem>>, %arg6: memref<32x64xbf16, #tpu.memory_space<vmem>>, %arg7: memref<1x64xf32, #tpu.memory_space<vmem>>, %arg8: memref<32x32xbf16, #tpu.memory_space<vmem>>, %arg9: memref<1x32xf32, #tpu.memory_space<vmem>>, %arg10: memref<1x8x32xbf16, #tpu.memory_space<vmem>>) attributes {dimension_semantics = [#tpu.dimension_semantics<parallel>], iteration_bounds = array<i64: 2>, scalar_prefetch = 0 : i64, scratch_operands = 0 : i64, tpu.core_type = #tpu.core_type<tc>, window_params = [{transform_indices = @transform_0, window_bounds = array<i64: 1, 8, 32>}, {transform_indices = @transform_1, window_bounds = array<i64: 1, 8, 32>}, {transform_indices = @transform_2, window_bounds = array<i64: 1, 1, 8, 8>}, {pipeline_mode = #tpu.pipeline_mode<synchronous>, transform_indices = @transform_3, window_bounds = array<i64: 32, 32>}, {pipeline_mode = #tpu.pipeline_mode<synchronous>, transform_indices = @transform_4, window_bounds = array<i64: 1, 32>}, {pipeline_mode = #tpu.pipeline_mode<synchronous>, transform_indices = @transform_5, window_bounds = array<i64: 32, 64>}, {pipeline_mode = #tpu.pipeline_mode<synchronous>, transform_indices = @transform_6, window_bounds = array<i64: 1, 64>}, {pipeline_mode = #tpu.pipeline_mode<synchronous>, transform_indices = @transform_7, window_bounds = array<i64: 32, 32>}, {pipeline_mode = #tpu.pipeline_mode<synchronous>, transform_indices = @transform_8, window_bounds = array<i64: 1, 32>}, {transform_indices = @transform_9, window_bounds = array<i64: 1, 8, 32>}]} {
    %c0 = arith.constant 0 : index
    %c0_0 = arith.constant 0 : index
    %c0_1 = arith.constant 0 : index
    %0 = vector.load %arg1[%c0, %c0_0, %c0_1] : memref<1x8x32xbf16, #tpu.memory_space<vmem>>, vector<1x8x32xbf16>
    %1 = vector.shape_cast %0 : vector<1x8x32xbf16> to vector<8x32xbf16>
    %c0_2 = arith.constant 0 : index
    %c0_3 = arith.constant 0 : index
    %c0_4 = arith.constant 0 : index
    %2 = vector.load %arg2[%c0_2, %c0_3, %c0_4] : memref<1x8x32xbf16, #tpu.memory_space<vmem>>, vector<1x8x32xbf16>
    %3 = vector.shape_cast %2 : vector<1x8x32xbf16> to vector<8x32xbf16>
    %c0_5 = arith.constant 0 : index
    %c0_6 = arith.constant 0 : index
    %c0_7 = arith.constant 0 : index
    %c0_8 = arith.constant 0 : index
    %4 = vector.load %arg3[%c0_5, %c0_6, %c0_7, %c0_8] : memref<1x1x8x8xf32, #tpu.memory_space<vmem>>, vector<1x1x8x8xf32>
    %5 = vector.shape_cast %4 : vector<1x1x8x8xf32> to vector<8x8xf32>
    %c0_9 = arith.constant 0 : index
    %c0_10 = arith.constant 0 : index
    %6 = vector.load %arg4[%c0_9, %c0_10] : memref<32x32xbf16, #tpu.memory_space<vmem>>, vector<32x32xbf16>
    %cst = arith.constant dense<0.000000e+00> : vector<8x32xf32>
    %7 = tpu.matmul %1, %6, %cst {dimension_numbers = #tpu.dot_dimension_numbers<[1], [0], [0], [1], [0, 0, 1, 1], [], []>} : vector<8x32xbf16>, vector<32x32xbf16>, vector<8x32xf32> -> vector<8x32xf32>
    %c0_11 = arith.constant 0 : index
    %c0_12 = arith.constant 0 : index
    %8 = vector.load %arg5[%c0_11, %c0_12] : memref<1x32xf32, #tpu.memory_space<vmem>>, vector<1x32xf32>
    %9 = vector.broadcast %8 : vector<1x32xf32> to vector<8x32xf32>
    %10 = arith.addf %7, %9 : vector<8x32xf32>
    %c0_13 = arith.constant 0 : index
    %c0_14 = arith.constant 0 : index
    %11 = vector.load %arg6[%c0_13, %c0_14] : memref<32x64xbf16, #tpu.memory_space<vmem>>, vector<32x64xbf16>
    %cst_15 = arith.constant dense<0.000000e+00> : vector<8x64xf32>
    %12 = tpu.matmul %3, %11, %cst_15 {dimension_numbers = #tpu.dot_dimension_numbers<[1], [0], [0], [1], [0, 0, 1, 1], [], []>} : vector<8x32xbf16>, vector<32x64xbf16>, vector<8x64xf32> -> vector<8x64xf32>
    %c0_16 = arith.constant 0 : index
    %c0_17 = arith.constant 0 : index
    %13 = vector.load %arg7[%c0_16, %c0_17] : memref<1x64xf32, #tpu.memory_space<vmem>>, vector<1x64xf32>
    %14 = vector.broadcast %13 : vector<1x64xf32> to vector<8x64xf32>
    %15 = arith.addf %12, %14 : vector<8x64xf32>
    %16 = arith.truncf %10 : vector<8x32xf32> to vector<8x32xbf16>
    %17 = vector.extract_strided_slice %15 {offsets = [0, 0], sizes = [8, 32], strides = [1, 1]} : vector<8x64xf32> to vector<8x32xf32>
    %18 = arith.truncf %17 : vector<8x32xf32> to vector<8x32xbf16>
    %19 = vector.extract_strided_slice %15 {offsets = [0, 32], sizes = [8, 32], strides = [1, 1]} : vector<8x64xf32> to vector<8x32xf32>
    %20 = arith.truncf %19 : vector<8x32xf32> to vector<8x32xbf16>
    %21 = vector.extract_strided_slice %16 {offsets = [0, 0], sizes = [8, 8], strides = [1, 1]} : vector<8x32xbf16> to vector<8x8xbf16>
    %22 = vector.extract_strided_slice %18 {offsets = [0, 0], sizes = [8, 8], strides = [1, 1]} : vector<8x32xbf16> to vector<8x8xbf16>
    %23 = vector.extract_strided_slice %20 {offsets = [0, 0], sizes = [8, 8], strides = [1, 1]} : vector<8x32xbf16> to vector<8x8xbf16>
    %cst_18 = arith.constant dense<0.000000e+00> : vector<8x8xf32>
    %24 = tpu.matmul %21, %22, %cst_18 {dimension_numbers = #tpu.dot_dimension_numbers<[1], [1], [0], [0], [0, 0, 1, 0], [], []>} : vector<8x8xbf16>, vector<8x8xbf16>, vector<8x8xf32> -> vector<8x8xf32>
    %cst_19 = arith.constant 0.353553385 : f32
    %25 = vector.broadcast %cst_19 : f32 to vector<8x8xf32>
    %26 = arith.mulf %24, %25 : vector<8x8xf32>
    %cst_20 = arith.constant 0.000000e+00 : f32
    %27 = vector.broadcast %cst_20 : f32 to vector<8x8xf32>
    %28 = arith.cmpf ogt, %5, %27 : vector<8x8xf32>
    %cst_21 = arith.constant -1.000000e+09 : f32
    %29 = vector.broadcast %cst_21 : f32 to vector<8x8xf32>
    %30 = arith.select %28, %26, %29 : vector<8x8xi1>, vector<8x8xf32>
    %cst_22 = arith.constant dense<0xFF800000> : vector<8xf32>
    %31 = vector.multi_reduction <maximumf>, %30, %cst_22 [1] : vector<8x8xf32> to vector<8xf32>
    %32 = vector.shape_cast %31 : vector<8xf32> to vector<8x1xf32>
    %33 = vector.broadcast %32 : vector<8x1xf32> to vector<8x8xf32>
    %34 = arith.subf %30, %33 : vector<8x8xf32>
    %35 = math.exp %34 : vector<8x8xf32>
    %cst_23 = arith.constant dense<0.000000e+00> : vector<8xf32>
    %36 = vector.multi_reduction <add>, %35, %cst_23 [1] : vector<8x8xf32> to vector<8xf32>
    %37 = vector.shape_cast %36 : vector<8xf32> to vector<8x1xf32>
    %38 = tpu.reciprocal %37 {approx = true} : vector<8x1xf32> -> vector<8x1xf32>
    %39 = vector.broadcast %38 : vector<8x1xf32> to vector<8x8xf32>
    %40 = arith.mulf %35, %39 : vector<8x8xf32>
    %41 = arith.truncf %40 : vector<8x8xf32> to vector<8x8xbf16>
    %cst_24 = arith.constant dense<0.000000e+00> : vector<8x8xf32>
    %42 = tpu.matmul %41, %23, %cst_24 {dimension_numbers = #tpu.dot_dimension_numbers<[1], [0], [0], [1], [0, 0, 1, 1], [], []>} : vector<8x8xbf16>, vector<8x8xbf16>, vector<8x8xf32> -> vector<8x8xf32>
    %43 = vector.extract_strided_slice %16 {offsets = [0, 8], sizes = [8, 8], strides = [1, 1]} : vector<8x32xbf16> to vector<8x8xbf16>
    %44 = vector.extract_strided_slice %18 {offsets = [0, 8], sizes = [8, 8], strides = [1, 1]} : vector<8x32xbf16> to vector<8x8xbf16>
    %45 = vector.extract_strided_slice %20 {offsets = [0, 8], sizes = [8, 8], strides = [1, 1]} : vector<8x32xbf16> to vector<8x8xbf16>
    %cst_25 = arith.constant dense<0.000000e+00> : vector<8x8xf32>
    %46 = tpu.matmul %43, %44, %cst_25 {dimension_numbers = #tpu.dot_dimension_numbers<[1], [1], [0], [0], [0, 0, 1, 0], [], []>} : vector<8x8xbf16>, vector<8x8xbf16>, vector<8x8xf32> -> vector<8x8xf32>
    %cst_26 = arith.constant 0.353553385 : f32
    %47 = vector.broadcast %cst_26 : f32 to vector<8x8xf32>
    %48 = arith.mulf %46, %47 : vector<8x8xf32>
    %cst_27 = arith.constant 0.000000e+00 : f32
    %49 = vector.broadcast %cst_27 : f32 to vector<8x8xf32>
    %50 = arith.cmpf ogt, %5, %49 : vector<8x8xf32>
    %cst_28 = arith.constant -1.000000e+09 : f32
    %51 = vector.broadcast %cst_28 : f32 to vector<8x8xf32>
    %52 = arith.select %50, %48, %51 : vector<8x8xi1>, vector<8x8xf32>
    %cst_29 = arith.constant dense<0xFF800000> : vector<8xf32>
    %53 = vector.multi_reduction <maximumf>, %52, %cst_29 [1] : vector<8x8xf32> to vector<8xf32>
    %54 = vector.shape_cast %53 : vector<8xf32> to vector<8x1xf32>
    %55 = vector.broadcast %54 : vector<8x1xf32> to vector<8x8xf32>
    %56 = arith.subf %52, %55 : vector<8x8xf32>
    %57 = math.exp %56 : vector<8x8xf32>
    %cst_30 = arith.constant dense<0.000000e+00> : vector<8xf32>
    %58 = vector.multi_reduction <add>, %57, %cst_30 [1] : vector<8x8xf32> to vector<8xf32>
    %59 = vector.shape_cast %58 : vector<8xf32> to vector<8x1xf32>
    %60 = tpu.reciprocal %59 {approx = true} : vector<8x1xf32> -> vector<8x1xf32>
    %61 = vector.broadcast %60 : vector<8x1xf32> to vector<8x8xf32>
    %62 = arith.mulf %57, %61 : vector<8x8xf32>
    %63 = arith.truncf %62 : vector<8x8xf32> to vector<8x8xbf16>
    %cst_31 = arith.constant dense<0.000000e+00> : vector<8x8xf32>
    %64 = tpu.matmul %63, %45, %cst_31 {dimension_numbers = #tpu.dot_dimension_numbers<[1], [0], [0], [1], [0, 0, 1, 1], [], []>} : vector<8x8xbf16>, vector<8x8xbf16>, vector<8x8xf32> -> vector<8x8xf32>
    %65 = vector.extract_strided_slice %16 {offsets = [0, 16], sizes = [8, 8], strides = [1, 1]} : vector<8x32xbf16> to vector<8x8xbf16>
    %66 = vector.extract_strided_slice %18 {offsets = [0, 16], sizes = [8, 8], strides = [1, 1]} : vector<8x32xbf16> to vector<8x8xbf16>
    %67 = vector.extract_strided_slice %20 {offsets = [0, 16], sizes = [8, 8], strides = [1, 1]} : vector<8x32xbf16> to vector<8x8xbf16>
    %cst_32 = arith.constant dense<0.000000e+00> : vector<8x8xf32>
    %68 = tpu.matmul %65, %66, %cst_32 {dimension_numbers = #tpu.dot_dimension_numbers<[1], [1], [0], [0], [0, 0, 1, 0], [], []>} : vector<8x8xbf16>, vector<8x8xbf16>, vector<8x8xf32> -> vector<8x8xf32>
    %cst_33 = arith.constant 0.353553385 : f32
    %69 = vector.broadcast %cst_33 : f32 to vector<8x8xf32>
    %70 = arith.mulf %68, %69 : vector<8x8xf32>
    %cst_34 = arith.constant 0.000000e+00 : f32
    %71 = vector.broadcast %cst_34 : f32 to vector<8x8xf32>
    %72 = arith.cmpf ogt, %5, %71 : vector<8x8xf32>
    %cst_35 = arith.constant -1.000000e+09 : f32
    %73 = vector.broadcast %cst_35 : f32 to vector<8x8xf32>
    %74 = arith.select %72, %70, %73 : vector<8x8xi1>, vector<8x8xf32>
    %cst_36 = arith.constant dense<0xFF800000> : vector<8xf32>
    %75 = vector.multi_reduction <maximumf>, %74, %cst_36 [1] : vector<8x8xf32> to vector<8xf32>
    %76 = vector.shape_cast %75 : vector<8xf32> to vector<8x1xf32>
    %77 = vector.broadcast %76 : vector<8x1xf32> to vector<8x8xf32>
    %78 = arith.subf %74, %77 : vector<8x8xf32>
    %79 = math.exp %78 : vector<8x8xf32>
    %cst_37 = arith.constant dense<0.000000e+00> : vector<8xf32>
    %80 = vector.multi_reduction <add>, %79, %cst_37 [1] : vector<8x8xf32> to vector<8xf32>
    %81 = vector.shape_cast %80 : vector<8xf32> to vector<8x1xf32>
    %82 = tpu.reciprocal %81 {approx = true} : vector<8x1xf32> -> vector<8x1xf32>
    %83 = vector.broadcast %82 : vector<8x1xf32> to vector<8x8xf32>
    %84 = arith.mulf %79, %83 : vector<8x8xf32>
    %85 = arith.truncf %84 : vector<8x8xf32> to vector<8x8xbf16>
    %cst_38 = arith.constant dense<0.000000e+00> : vector<8x8xf32>
    %86 = tpu.matmul %85, %67, %cst_38 {dimension_numbers = #tpu.dot_dimension_numbers<[1], [0], [0], [1], [0, 0, 1, 1], [], []>} : vector<8x8xbf16>, vector<8x8xbf16>, vector<8x8xf32> -> vector<8x8xf32>
    %87 = vector.extract_strided_slice %16 {offsets = [0, 24], sizes = [8, 8], strides = [1, 1]} : vector<8x32xbf16> to vector<8x8xbf16>
    %88 = vector.extract_strided_slice %18 {offsets = [0, 24], sizes = [8, 8], strides = [1, 1]} : vector<8x32xbf16> to vector<8x8xbf16>
    %89 = vector.extract_strided_slice %20 {offsets = [0, 24], sizes = [8, 8], strides = [1, 1]} : vector<8x32xbf16> to vector<8x8xbf16>
    %cst_39 = arith.constant dense<0.000000e+00> : vector<8x8xf32>
    %90 = tpu.matmul %87, %88, %cst_39 {dimension_numbers = #tpu.dot_dimension_numbers<[1], [1], [0], [0], [0, 0, 1, 0], [], []>} : vector<8x8xbf16>, vector<8x8xbf16>, vector<8x8xf32> -> vector<8x8xf32>
    %cst_40 = arith.constant 0.353553385 : f32
    %91 = vector.broadcast %cst_40 : f32 to vector<8x8xf32>
    %92 = arith.mulf %90, %91 : vector<8x8xf32>
    %cst_41 = arith.constant 0.000000e+00 : f32
    %93 = vector.broadcast %cst_41 : f32 to vector<8x8xf32>
    %94 = arith.cmpf ogt, %5, %93 : vector<8x8xf32>
    %cst_42 = arith.constant -1.000000e+09 : f32
    %95 = vector.broadcast %cst_42 : f32 to vector<8x8xf32>
    %96 = arith.select %94, %92, %95 : vector<8x8xi1>, vector<8x8xf32>
    %cst_43 = arith.constant dense<0xFF800000> : vector<8xf32>
    %97 = vector.multi_reduction <maximumf>, %96, %cst_43 [1] : vector<8x8xf32> to vector<8xf32>
    %98 = vector.shape_cast %97 : vector<8xf32> to vector<8x1xf32>
    %99 = vector.broadcast %98 : vector<8x1xf32> to vector<8x8xf32>
    %100 = arith.subf %96, %99 : vector<8x8xf32>
    %101 = math.exp %100 : vector<8x8xf32>
    %cst_44 = arith.constant dense<0.000000e+00> : vector<8xf32>
    %102 = vector.multi_reduction <add>, %101, %cst_44 [1] : vector<8x8xf32> to vector<8xf32>
    %103 = vector.shape_cast %102 : vector<8xf32> to vector<8x1xf32>
    %104 = tpu.reciprocal %103 {approx = true} : vector<8x1xf32> -> vector<8x1xf32>
    %105 = vector.broadcast %104 : vector<8x1xf32> to vector<8x8xf32>
    %106 = arith.mulf %101, %105 : vector<8x8xf32>
    %107 = arith.truncf %106 : vector<8x8xf32> to vector<8x8xbf16>
    %cst_45 = arith.constant dense<0.000000e+00> : vector<8x8xf32>
    %108 = tpu.matmul %107, %89, %cst_45 {dimension_numbers = #tpu.dot_dimension_numbers<[1], [0], [0], [1], [0, 0, 1, 1], [], []>} : vector<8x8xbf16>, vector<8x8xbf16>, vector<8x8xf32> -> vector<8x8xf32>
    %109 = tpu.concatenate %42, %64, %86, %108 in 1 : vector<8x8xf32>, vector<8x8xf32>, vector<8x8xf32>, vector<8x8xf32> -> vector<8x32xf32>
    %110 = arith.truncf %109 : vector<8x32xf32> to vector<8x32xbf16>
    %c0_46 = arith.constant 0 : index
    %c0_47 = arith.constant 0 : index
    %111 = vector.load %arg8[%c0_46, %c0_47] : memref<32x32xbf16, #tpu.memory_space<vmem>>, vector<32x32xbf16>
    %cst_48 = arith.constant dense<0.000000e+00> : vector<8x32xf32>
    %112 = tpu.matmul %110, %111, %cst_48 {dimension_numbers = #tpu.dot_dimension_numbers<[1], [0], [0], [1], [0, 0, 1, 1], [], []>} : vector<8x32xbf16>, vector<32x32xbf16>, vector<8x32xf32> -> vector<8x32xf32>
    %c0_49 = arith.constant 0 : index
    %c0_50 = arith.constant 0 : index
    %113 = vector.load %arg9[%c0_49, %c0_50] : memref<1x32xf32, #tpu.memory_space<vmem>>, vector<1x32xf32>
    %114 = vector.broadcast %113 : vector<1x32xf32> to vector<8x32xf32>
    %115 = arith.addf %112, %114 : vector<8x32xf32>
    %116 = arith.truncf %115 : vector<8x32xf32> to vector<8x32xbf16>
    %c0_51 = arith.constant 0 : index
    %c0_52 = arith.constant 0 : index
    %c0_53 = arith.constant 0 : index
    %117 = vector.load %arg10[%c0_51, %c0_52, %c0_53] : memref<1x8x32xbf16, #tpu.memory_space<vmem>>, vector<1x8x32xbf16>
    %118 = vector.shape_cast %117 : vector<1x8x32xbf16> to vector<8x32xbf16>
    %119 = vector.shape_cast %116 : vector<8x32xbf16> to vector<1x8x32xbf16>
    tpu.vector_store %arg10[%c0_51, %c0_52, %c0_53], %119 {strides = array<i32>} : memref<1x8x32xbf16, #tpu.memory_space<vmem>>, vector<1x8x32xbf16>,
    return
  }
  func.func @transform_0(%arg0: i32) -> (i32, i32, i32) {
    %c0_i32 = arith.constant 0 : i32
    %c0_i32_0 = arith.constant 0 : i32
    %c0_i32_1 = arith.constant 0 : i32
    return %arg0, %c0_i32, %c0_i32_0 : i32, i32, i32
  }
  func.func @transform_1(%arg0: i32) -> (i32, i32, i32) {
    %c0_i32 = arith.constant 0 : i32
    %c0_i32_0 = arith.constant 0 : i32
    %c0_i32_1 = arith.constant 0 : i32
    return %arg0, %c0_i32, %c0_i32_0 : i32, i32, i32
  }
  func.func @transform_2(%arg0: i32) -> (i32, i32, i32, i32) {
    %c0_i32 = arith.constant 0 : i32
    %c0_i32_0 = arith.constant 0 : i32
    %c0_i32_1 = arith.constant 0 : i32
    %c0_i32_2 = arith.constant 0 : i32
    return %arg0, %c0_i32, %c0_i32_0, %c0_i32_1 : i32, i32, i32, i32
  }
  func.func @transform_3(%arg0: i32) -> (i32, i32) {
    %c0_i32 = arith.constant 0 : i32
    %c0_i32_0 = arith.constant 0 : i32
    %c0_i32_1 = arith.constant 0 : i32
    return %c0_i32, %c0_i32_0 : i32, i32
  }
  func.func @transform_4(%arg0: i32) -> (i32, i32) {
    %c0_i32 = arith.constant 0 : i32
    %c0_i32_0 = arith.constant 0 : i32
    %c0_i32_1 = arith.constant 0 : i32
    return %c0_i32, %c0_i32_0 : i32, i32
  }
  func.func @transform_5(%arg0: i32) -> (i32, i32) {
    %c0_i32 = arith.constant 0 : i32
    %c0_i32_0 = arith.constant 0 : i32
    %c0_i32_1 = arith.constant 0 : i32
    return %c0_i32, %c0_i32_0 : i32, i32
  }
  func.func @transform_6(%arg0: i32) -> (i32, i32) {
    %c0_i32 = arith.constant 0 : i32
    %c0_i32_0 = arith.constant 0 : i32
    %c0_i32_1 = arith.constant 0 : i32
    return %c0_i32, %c0_i32_0 : i32, i32
  }
  func.func @transform_7(%arg0: i32) -> (i32, i32) {
    %c0_i32 = arith.constant 0 : i32
    %c0_i32_0 = arith.constant 0 : i32
    %c0_i32_1 = arith.constant 0 : i32
    return %c0_i32, %c0_i32_0 : i32, i32
  }
  func.func @transform_8(%arg0: i32) -> (i32, i32) {
    %c0_i32 = arith.constant 0 : i32
    %c0_i32_0 = arith.constant 0 : i32
    %c0_i32_1 = arith.constant 0 : i32
    return %c0_i32, %c0_i32_0 : i32, i32
  }
  func.func @transform_9(%arg0: i32) -> (i32, i32, i32) {
    %c0_i32 = arith.constant 0 : i32
    %c0_i32_0 = arith.constant 0 : i32
    %c0_i32_1 = arith.constant 0 : i32
    return %arg0, %c0_i32, %c0_i32_0 : i32, i32, i32
  }
}

module attributes {stable_mosaic.version = 11 : i64} {
  func.func @_ffn_kernel(%arg0: i32, %arg1: memref<16x32xbf16, #tpu.memory_space<vmem>>, %arg2: memref<32x64xbf16, #tpu.memory_space<vmem>>, %arg3: memref<1x64xf32, #tpu.memory_space<vmem>>, %arg4: memref<64x32xbf16, #tpu.memory_space<vmem>>, %arg5: memref<1x32xf32, #tpu.memory_space<vmem>>, %arg6: memref<16x32xf32, #tpu.memory_space<vmem>>) attributes {dimension_semantics = [#tpu.dimension_semantics<parallel>], iteration_bounds = array<i64: 1>, scalar_prefetch = 0 : i64, scratch_operands = 0 : i64, tpu.core_type = #tpu.core_type<tc>, window_params = [{transform_indices = @transform_0, window_bounds = array<i64: 16, 32>}, {pipeline_mode = #tpu.pipeline_mode<synchronous>, transform_indices = @transform_1, window_bounds = array<i64: 32, 64>}, {pipeline_mode = #tpu.pipeline_mode<synchronous>, transform_indices = @transform_2, window_bounds = array<i64: 1, 64>}, {pipeline_mode = #tpu.pipeline_mode<synchronous>, transform_indices = @transform_3, window_bounds = array<i64: 64, 32>}, {pipeline_mode = #tpu.pipeline_mode<synchronous>, transform_indices = @transform_4, window_bounds = array<i64: 1, 32>}, {transform_indices = @transform_5, window_bounds = array<i64: 16, 32>}]} {
    %c0 = arith.constant 0 : index
    %c0_0 = arith.constant 0 : index
    %0 = vector.load %arg1[%c0, %c0_0] : memref<16x32xbf16, #tpu.memory_space<vmem>>, vector<16x32xbf16>
    %c0_1 = arith.constant 0 : index
    %c0_2 = arith.constant 0 : index
    %1 = vector.load %arg2[%c0_1, %c0_2] : memref<32x64xbf16, #tpu.memory_space<vmem>>, vector<32x64xbf16>
    %cst = arith.constant dense<0.000000e+00> : vector<16x64xf32>
    %2 = tpu.matmul %0, %1, %cst {dimension_numbers = #tpu.dot_dimension_numbers<[1], [0], [0], [1], [0, 0, 1, 1], [], []>} : vector<16x32xbf16>, vector<32x64xbf16>, vector<16x64xf32> -> vector<16x64xf32>
    %c0_3 = arith.constant 0 : index
    %c0_4 = arith.constant 0 : index
    %3 = vector.load %arg3[%c0_3, %c0_4] : memref<1x64xf32, #tpu.memory_space<vmem>>, vector<1x64xf32>
    %4 = vector.broadcast %3 : vector<1x64xf32> to vector<16x64xf32>
    %5 = arith.addf %2, %4 : vector<16x64xf32>
    %cst_5 = arith.constant 0.000000e+00 : f32
    %6 = vector.broadcast %cst_5 : f32 to vector<16x64xf32>
    %7 = arith.maximumf %5, %6 : vector<16x64xf32>
    %8 = arith.truncf %7 : vector<16x64xf32> to vector<16x64xbf16>
    %c0_6 = arith.constant 0 : index
    %c0_7 = arith.constant 0 : index
    %9 = vector.load %arg4[%c0_6, %c0_7] : memref<64x32xbf16, #tpu.memory_space<vmem>>, vector<64x32xbf16>
    %cst_8 = arith.constant dense<0.000000e+00> : vector<16x32xf32>
    %10 = tpu.matmul %8, %9, %cst_8 {dimension_numbers = #tpu.dot_dimension_numbers<[1], [0], [0], [1], [0, 0, 1, 1], [], []>} : vector<16x64xbf16>, vector<64x32xbf16>, vector<16x32xf32> -> vector<16x32xf32>
    %c0_9 = arith.constant 0 : index
    %c0_10 = arith.constant 0 : index
    %11 = vector.load %arg5[%c0_9, %c0_10] : memref<1x32xf32, #tpu.memory_space<vmem>>, vector<1x32xf32>
    %12 = vector.broadcast %11 : vector<1x32xf32> to vector<16x32xf32>
    %13 = arith.addf %10, %12 : vector<16x32xf32>
    %c0_11 = arith.constant 0 : index
    %c0_12 = arith.constant 0 : index
    %14 = vector.load %arg6[%c0_11, %c0_12] : memref<16x32xf32, #tpu.memory_space<vmem>>, vector<16x32xf32>
    tpu.vector_store %arg6[%c0_11, %c0_12], %13 {strides = array<i32>} : memref<16x32xf32, #tpu.memory_space<vmem>>, vector<16x32xf32>,
    return
  }
  func.func @transform_0(%arg0: i32) -> (i32, i32) {
    %c0_i32 = arith.constant 0 : i32
    %c0_i32_0 = arith.constant 0 : i32
    return %arg0, %c0_i32 : i32, i32
  }
  func.func @transform_1(%arg0: i32) -> (i32, i32) {
    %c0_i32 = arith.constant 0 : i32
    %c0_i32_0 = arith.constant 0 : i32
    %c0_i32_1 = arith.constant 0 : i32
    return %c0_i32, %c0_i32_0 : i32, i32
  }
  func.func @transform_2(%arg0: i32) -> (i32, i32) {
    %c0_i32 = arith.constant 0 : i32
    %c0_i32_0 = arith.constant 0 : i32
    %c0_i32_1 = arith.constant 0 : i32
    return %c0_i32, %c0_i32_0 : i32, i32
  }
  func.func @transform_3(%arg0: i32) -> (i32, i32) {
    %c0_i32 = arith.constant 0 : i32
    %c0_i32_0 = arith.constant 0 : i32
    %c0_i32_1 = arith.constant 0 : i32
    return %c0_i32, %c0_i32_0 : i32, i32
  }
  func.func @transform_4(%arg0: i32) -> (i32, i32) {
    %c0_i32 = arith.constant 0 : i32
    %c0_i32_0 = arith.constant 0 : i32
    %c0_i32_1 = arith.constant 0 : i32
    return %c0_i32, %c0_i32_0 : i32, i32
  }
  func.func @transform_5(%arg0: i32) -> (i32, i32) {
    %c0_i32 = arith.constant 0 : i32
    %c0_i32_0 = arith.constant 0 : i32
    return %arg0, %c0_i32 : i32, i32
  }
}

</mosaic_0001>

<bundles_post_ra>
// kernel: decoder_layer.4
= control target key start
LH: loop header
LB: loop body
LE: loop exit
PB: predicated region body
PF: predicated region fallthrough
CT: control target
= control target key end

     0   :  { %s1354_s30 = smov 0   ;;  %s1491_s0 = inlined_call_operand.vmem [shape: bf16[2,8,32], index: 0, kind: input, shape index: {}]   ;;  %s1492_s1 = inlined_call_operand.vmem [shape: bf16[2,8,32], index: 1, kind: input, shape index: {}]   ;;  %s1493_s2 = inlined_call_operand.vmem [shape: f32[2,1,8,8], index: 2, kind: input, shape index: {}]   ;;  %s1494_s3 = inlined_call_operand.vmem [shape: bf16[32,32], index: 3, kind: input, shape index: {}]   ;;  %s1495_s4 = inlined_call_operand.vmem [shape: f32[1,32], index: 4, kind: input, shape index: {}]   ;;  %s1496_s5 = inlined_call_operand.vmem [shape: bf16[32,64], index: 5, kind: input, shape index: {}]   ;;  %s1497_s6 = inlined_call_operand.vmem [shape: f32[1,64], index: 6, kind: input, shape index: {}]   ;;  %s1498_s7 = inlined_call_operand.vmem [shape: bf16[32,32], index: 7, kind: input, shape index: {}]   ;;  %s1499_s8 = inlined_call_operand.vmem [shape: f32[1,32], index: 8, kind: input, shape index: {}]   ;;  %s1500_s9 = inlined_call_operand.vmem [shape: bf16[2,8,32], index: 9, kind: output, shape index: {}]  }
   0x1 LB: > { %s1114_s10 = sadd.s32 4294967295, %s1290_s30   ;;  %p1118_p0 = scmp.ge.s32.totalorder %s1290_s30, 1  ;;  %s1290_s30 = sphi %s1354_s30, %s19_s30  }
   0x2   : > { %p304_p1 = scmp.lt.s32.totalorder %s1290_s30, 3 }
   0x4   : > { %p305_p2 = pnand %p1118_p0, %p304_p1 }
   0x5   : > { %v1262_v0 = vld [vmem:[%s1496_s5] sm:$0xff] (!%p305_p2)   ;;  %v1292_v1 = vmov (!%p305_p2), 0.0   ;;  %v1264_v3 = vld [vmem:[%s1496_s5 + $0x8] sm:$0xff] (!%p305_p2)   ;;  %vm1293_vm0 = vmmov (!%p305_p2), 0   ;;  %p346_p3 = scmp.lt.s32.totalorder (!%p305_p2), %s1114_s10, 1  ;;  %vm389_vm1 = vcmask (!%p305_p2), 261120  }
   0x6   : > { %308 = sbr.rel (%p305_p2) target bundleno = 1459 (0x5b3), region = 56  ;;  %1178 = vmatprep.subr.bf16.mxu1 (!%p305_p2), %v1292_v1  ;;  %1170 = vmatprep.subr.bf16.mxu0 (!%p305_p2), %v1292_v1  ;;  %v1263_v2 = vld [vmem:[%s1494_s3] sm:$0xff] (!%p305_p2)   ;;  %v1265_v4 = vld [vmem:[%s1494_s3 + $0x8] sm:$0xff] (!%p305_p2)   ;;  %vm501_vm2 = vcmask (!%p305_p2), 64512   ;;  %s1294_s11 = smov (!%p305_p2), 112   ;;  %vm569_vm4 = vcmask (!%p305_p2), 1043456  }
   0x7   : > { %1179 = vmatpush3.bf16.msra.mxu1 (!%p305_p2), %v1262_v0  ;;  %1182 = vmatprep.mubr.msk.bf16.mxu1 (!%p305_p2), %vm1293_vm0, %v1292_v1  ;;  %v1127_v7 = vld [vmem:[%s1497_s6] ss:$0 sm:$0xff] (!%p305_p2)  ;;  %s1295_s12 = smov (!%p305_p2), 120   ;;  %s1296_s13 = smov (!%p305_p2), 104   ;;  %vm963_vm5 = vcmask (!%p305_p2), 130048   ;;  %vm965_vm6 = vcmask (!%p305_p2), 195584  }
   0x8   : > { %1180 = vmatprep.subr.bf16.mxu1 (!%p305_p2), %v1292_v1  ;;  %1171 = vmatpush3.bf16.msra.mxu0 (!%p305_p2), %v1263_v2  ;;  %v1123_v8 = vld [vmem:[%s1495_s4] ss:$0 sm:$0xff] (!%p305_p2)  ;;  %s1298_s18 = smov (!%p305_p2), 80   ;;  %s1299_s20 = smov (!%p305_p2), 72   ;;  %vm1035_vm7 = vcmask (!%p305_p2), 257024  }
   0x9   : > { %1172 = vmatprep.subr.bf16.mxu0 (!%p305_p2), %v1292_v1  ;;  %1174 = vmatprep.mubr.msk.bf16.mxu0 (!%p305_p2), %vm1293_vm0, %v1292_v1  ;;  %s1300_s21 = smov (!%p305_p2), 88   ;;  %s1301_s24 = smov (!%p305_p2), 8  }
   0xa   : > { %s1302_s27 = smov (!%p305_p2), 16   ;;  %s1303_s28 = smov (!%p305_p2), 24  }
   0xb   : > { %1181 = vmatpush3.bf16.msra.mxu1 (!%p305_p2), %v1264_v3 }
   0xc   : > { %1173 = vmatpush3.bf16.msra.mxu0 (!%p305_p2), %v1265_v4  ;;  %1192 = vmatprep.subr.bf16.mxu1 (!%p305_p2), %v1292_v1 }
   0xd   : > { %s1502_s10 = smov (!%p346_p3, %s1114_s10), 1  ;;  %1186 = vmatprep.subr.bf16.mxu0 %v1292_v1 }
   0xe   : > { %s1385_s19 = sshll.u32 %s1502_s10, 2  ;;  %s1121_s14 = sshll.u32 %s1502_s10, 3 }
   0xf   : > { %s353_s22 = scalar_lea.vmem %s1492_s1, %s1385_s19  ;;  %s349_s25 = scalar_lea.vmem %s1491_s0, %s1385_s19 }
  0x10   : > { %v364_v5 = vld [vmem:[%s353_s22] sm:$0xf]  ;;  %s357_s17 = scalar_lea.vmem %s1493_s2, %s1121_s14  ;;  %s1297_s10 = smov 96  }
  0x11   : > { %v363_v6 = vld [vmem:[%s349_s25] sm:$0xf]  ;;  %1183 = vmatmul.mubr.msk.bf16.vlgmr.msra.gmra.mrb[0].mxu1 %vm389_vm1, %v364_v5  ;;  %s361_s14 = scalar_lea.vmem %s1500_s9, %s1385_s19 }
  0x12   : > { %1175 = vmatmul.mubr.msk.bf16.vlgmr.msra.gmra.mrb[0].mxu0 %vm389_vm1, %v363_v6  ;;  %1194 = vmatprep.mubr.msk.bf16.mxu1 %vm1293_vm0, %v1292_v1  ;;  %v365_v31 = vld [vmem:[%s357_s17] sm:$0xff] }
  0x13   : > { %1188 = vmatprep.mubr.msk.bf16.mxu0 %vm1293_vm0, %v1292_v1  ;;  %vm549_vm3 = vcmp.gt.f32.partialorder %v365_v31, 0.0 }
  0xe4   : > { %v493_v9 = vpop.f32.mrb[0].mxu1 }
  0xe5   : > { %v494_v10 = vadd.f32 %v1127_v7, %v493_v9  ;;  %v1184_v11 = vpop.f32.mrb[1].mxu1  ;;  %v427_v12 = vpop.f32.mrb[0].mxu0 }
  0xe6   : > { %v496_v13 = vpop.f32.mrb[2].mxu1  ;;  %v428_v14 = vadd.f32 %v1123_v8, %v427_v12  ;;  %v1176_v15 = vpop.f32.mrb[1].mxu0 }
  0xe7   : > { %v1409_v16 = vpack.c.bf16 %v494_v10, %v494_v10  ;;  %v1185_v17 = vpop.f32.mrb[3].mxu1  ;;  %v430_v18 = vpop.f32.mrb[2].mxu0 }
  0xe8   : > { %v1177_v19 = vpop.f32.mrb[3].mxu0  ;;  %v499_v20 = vpack.c.bf16 %v428_v14, %v428_v14 }
  0xe9   : > { %728 = vrot.lane.b32.xlu1 %v1409_v16, %s1294_s11  ;;  %616 = vrot.lane.b32.xlu0 %v1409_v16, %s1295_s12  ;;  %v506_v21 = vsel %vm501_vm2, %v1409_v16, 0 }
  0xea   : > { %1187 = vmatpush3.bf16.xpose.msra.mxu0 %v506_v21 }
  0xeb   : > { %1198 = vmatprep.subr.bf16.mxu0 %v1292_v1 }
  0xed   : > { %726 = vrot.lane.b32.xlu1 %v499_v20, %s1294_s11  ;;  %614 = vrot.lane.b32.xlu0 %v499_v20, %s1295_s12 }
  0xf1   : > { %838 = vrot.lane.b32.xlu1 %v499_v20, %s1296_s13  ;;  %840 = vrot.lane.b32.xlu0 %v1409_v16, %s1296_s13 }
  0xf2   : > { %1189 = vmatmul.mubr.msk.bf16.vlgmr.msra.gmra.mrb[4].mxu0 %vm501_vm2, %v499_v20 }
  0xf3   : > { %1200 = vmatprep.mubr.msk.bf16.mxu0 %vm1293_vm0, %v1292_v1 }
 0x15b   : > { %v617_v22 = vpop.permute.xlu0 %616  ;;  %v729_v24 = vpop.permute.xlu1 %728 }
 0x15c   : > { %v622_v23 = vsel %vm501_vm2, %v617_v22, 0  ;;  %v734_v26 = vsel %vm501_vm2, %v729_v24, 0 }
 0x15d   : > { %1199 = vmatpush3.bf16.xpose.msra.mxu0 %v622_v23 }
 0x15e   : > { %1210 = vmatprep.subr.bf16.mxu0 %v1292_v1 }
 0x15f   : > { %v615_v25 = vpop.permute.xlu0 %614  ;;  %v727_v28 = vpop.permute.xlu1 %726 }
 0x163   : > { %v841_v27 = vpop.permute.xlu0 %840  ;;  %v839_v30 = vpop.permute.xlu1 %838 }
 0x164   : > { %1201 = vmatmul.mubr.msk.bf16.vlgmr.msra.gmra.mrb[8].mxu0 %vm501_vm2, %v615_v25  ;;  %v846_v29 = vsel %vm501_vm2, %v841_v27, 0 }
 0x165   : > { %1211 = vmatpush3.bf16.xpose.msra.mxu0 %v734_v26  ;;  %1212 = vmatprep.mubr.msk.bf16.mxu0 %vm1293_vm0, %v1292_v1 }
 0x166   : > { %1222 = vmatprep.subr.bf16.mxu0 %v1292_v1 }
 0x16c   : > { %1213 = vmatmul.mubr.msk.bf16.vlgmr.msra.gmra.mrb[12].mxu0 %vm501_vm2, %v727_v28 }
 0x16d   : > { %1223 = vmatpush3.bf16.xpose.msra.mxu0 %v846_v29  ;;  %1224 = vmatprep.mubr.msk.bf16.mxu0 %vm1293_vm0, %v1292_v1 }
 0x16e   : > { %1234 = vmatprep.subr.bf16.mxu0 %v1292_v1 }
 0x174   : > { %1225 = vmatmul.mubr.msk.bf16.vlgmr.msra.gmra.mrb[16].mxu0 %vm501_vm2, %v839_v30 }
 0x175   : > { %1238 = vmatprep.mubr.msk.bf16.mxu0 %vm1293_vm0, %v1292_v1 }
 0x1c5   : > { %v542_v32 = vpop.f32.mrb[4].mxu0 }
 0x1c6   : > { %v548_v33 = vmul.f32 0.35355338, %v542_v32  ;;  %v1190_v34 = vpop.f32.mrb[5].mxu0 }
 0x1c7   : > { %v545_v35 = vpop.f32.mrb[6].mxu0 }
 0x1c8   : > { %v1191_v36 = vpop.f32.mrb[7].mxu0  ;;  %v550_v37 = vsel %vm549_vm3, %v548_v33, -1e+09 }
 0x1c9   : > { %v551_v38 = vsel %vm501_vm2, %v550_v37, -inf }
 0x1ca   : > { %552 = vmax.xlane.f32.xlu0 %v551_v38 }
 0x237   : > { %v658_v39 = vpop.f32.mrb[8].mxu0 }
 0x238   : > { %v664_v40 = vmul.f32 0.35355338, %v658_v39  ;;  %v1202_v41 = vpop.f32.mrb[9].mxu0 }
 0x239   : > { %v661_v42 = vpop.f32.mrb[10].mxu0 }
 0x23a   : > { %v1203_v43 = vpop.f32.mrb[11].mxu0  ;;  %v665_v44 = vsel %vm549_vm3, %v664_v40, -1e+09 }
 0x23b   : > { %v666_v45 = vsel %vm501_vm2, %v665_v44, -inf }
 0x23c   : > { %667 = vmax.xlane.f32.xlu1 %v666_v45  ;;  %v1266_v45 = vld [vmem:[%s1498_s7] sm:$0xff]  }
 0x23d   : > { %1235 = vmatpush3.bf16.msra.mxu0 %v1266_v45 }
 0x23e   : > { %1236 = vmatprep.subr.bf16.mxu0 %v1292_v1 }
 0x23f   : > { %v770_v46 = vpop.f32.mrb[12].mxu0 }
 0x240   : > { %v776_v47 = vmul.f32 0.35355338, %v770_v46  ;;  %v1214_v48 = vpop.f32.mrb[13].mxu0 }
 0x241   : > { %v773_v49 = vpop.f32.mrb[14].mxu0 }
 0x242   : > { %v1215_v50 = vpop.f32.mrb[15].mxu0  ;;  %v777_v51 = vsel %vm549_vm3, %v776_v47, -1e+09 }
 0x243   : > { %v778_v52 = vsel %vm501_vm2, %v777_v51, -inf  ;;  %v1267_v50 = vld [vmem:[%s1498_s7 + $0x8] sm:$0xff]  }
 0x244   : > { %779 = vmax.xlane.f32.xlu0 %v778_v52  ;;  %1237 = vmatpush3.bf16.msra.mxu0 %v1267_v50 }
 0x247   : > { %v882_v53 = vpop.f32.mrb[16].mxu0 }
 0x248   : > { %v888_v54 = vmul.f32 0.35355338, %v882_v53  ;;  %v1226_v55 = vpop.f32.mrb[17].mxu0 }
 0x249   : > { %v885_v56 = vpop.f32.mrb[18].mxu0 }
 0x24a   : > { %v1227_v57 = vpop.f32.mrb[19].mxu0  ;;  %v889_v58 = vsel %vm549_vm3, %v888_v54, -1e+09 }
 0x24b   : > { %v890_v59 = vsel %vm501_vm2, %v889_v58, -inf }
 0x24c   : > { %891 = vmax.xlane.f32.xlu0 %v890_v59 }
 0x257   : > { %v553_v60 = vpop.xlane.xlu0 %552 }
 0x258   : > { %v554_v61 = vsub.f32 %v550_v37, %v553_v60 }
 0x25a   : > { %v555_v62 = vmul.f32 1.442695, %v554_v61 }
 0x25c   : > { %1268 = vpow2.f32 %v555_v62 }
 0x266   : > { %v1269_v63 = vpop.eup %1268 }
 0x267   : > { %v557_v0 = vsel %vm501_vm2, %v1269_v63, 0.0 }
 0x268   : > { %558 = vadd.xlane.f32.xlu1 %v557_v0 }
 0x279   : > { %564 = vrot.lane.b32.xlu1 %v1409_v16, %s1297_s10 }
 0x2c9   : > { %v668_v2 = vpop.xlane.xlu1 %667 }
 0x2ca   : > { %v669_v3 = vsub.f32 %v665_v44, %v668_v2  ;;  %v1139_v2 = vld [vmem:[%s1499_s8] ss:$0 sm:$0xff] }
 0x2cc   : > { %v670_v4 = vmul.f32 1.442695, %v669_v3 }
 0x2ce   : > { %1270 = vpow2.f32 %v670_v4 }
 0x2d1   : > { %v780_v5 = vpop.xlane.xlu0 %779 }
 0x2d2   : > { %v781_v6 = vsub.f32 %v777_v51, %v780_v5 }
 0x2d4   : > { %v782_v7 = vmul.f32 1.442695, %v781_v6 }
 0x2d6   : > { %1272 = vpow2.f32 %v782_v7 }
 0x2d8   : > { %v1271_v8 = vpop.eup %1270 }
 0x2d9   : > { %v892_v9 = vpop.xlane.xlu0 %891  ;;  %v672_v10 = vsel %vm501_vm2, %v1271_v8, 0.0 }
 0x2da   : > { %v893_v11 = vsub.f32 %v889_v58, %v892_v9  ;;  %673 = vadd.xlane.f32.xlu0 %v672_v10 }
 0x2dc   : > { %v894_v12 = vmul.f32 1.442695, %v893_v11 }
 0x2de   : > { %1274 = vpow2.f32 %v894_v12 }
 0x2e0   : > { %v1273_v13 = vpop.eup %1272 }
 0x2e1   : > { %v784_v14 = vsel %vm501_vm2, %v1273_v13, 0.0 }
 0x2e2   : > { %785 = vadd.xlane.f32.xlu1 %v784_v14 }
 0x2e8   : > { %v1275_v15 = vpop.eup %1274 }
 0x2e9   : > { %v896_v17 = vsel %vm501_vm2, %v1275_v15, 0.0 }
 0x2ea   : > { %897 = vadd.xlane.f32.xlu0 %v896_v17 }
 0x2f3   : > { %790 = vrot.lane.b32.xlu1 %v1409_v16, %s1298_s18 }
 0x2f5   : > { %v559_v18 = vpop.xlane.xlu1 %558 }
 0x2f6   : > { %1276 = vrcp.f32 %v559_v18 }
 0x2f7   : > { %902 = vrot.lane.b32.xlu1 %v1409_v16, %s1299_s20 }
 0x2f9   : > { %v565_v19 = vpop.permute.xlu1 %564 }
 0x2fa   : > { %v571_v20 = vsel %vm569_vm4, %v565_v19, 0 }
 0x2fb   : > { %1193 = vmatpush3.bf16.msra.mxu1 %v571_v20 }
 0x2fc   : > { %1204 = vmatprep.subr.bf16.mxu1 %v1292_v1 }
 0x300   : > { %v1277_v21 = vpop.eup %1276  ;;  %678 = vrot.lane.b32.xlu0 %v1409_v16, %s1300_s21 }
 0x301   : > { %v561_v22 = vmul.f32 %v1277_v21, %v1269_v63 }
 0x303   : > { %v562_v23 = vpack.c.bf16 %v561_v22, %v561_v22 }
 0x305   : > { %1195 = vmatmul.mubr.msk.bf16.vlgmr.msra.gmra.mrb[4].mxu1 %vm501_vm2, %v562_v23 }
 0x306   : > { %1206 = vmatprep.mubr.msk.bf16.mxu1 %vm1293_vm0, %v1292_v1 }
 0x367   : > { %v674_v24 = vpop.xlane.xlu0 %673 }
 0x368   : > { %1278 = vrcp.f32 %v674_v24 }
 0x36f   : > { %v786_v25 = vpop.xlane.xlu1 %785 }
 0x370   : > { %1280 = vrcp.f32 %v786_v25 }
 0x372   : > { %v1279_v26 = vpop.eup %1278 }
 0x373   : > { %v676_v28 = vmul.f32 %v1279_v26, %v1271_v8  ;;  %v791_v31 = vpop.permute.xlu1 %790 }
 0x374   : > { %v796_v33 = vsel %vm569_vm4, %v791_v31, 0 }
 0x375   : > { %v677_v16 = vpack.c.bf16 %v676_v28, %v676_v28 }
 0x377   : > { %v898_v27 = vpop.xlane.xlu0 %897  ;;  %v903_v35 = vpop.permute.xlu1 %902 }
 0x378   : > { %1282 = vrcp.f32 %v898_v27  ;;  %v908_v38 = vsel %vm569_vm4, %v903_v35, 0 }
 0x37a   : > { %v1281_v32 = vpop.eup %1280 }
 0x37b   : > { %v679_v29 = vpop.permute.xlu0 %678  ;;  %v788_v34 = vmul.f32 %v1281_v32, %v1273_v13 }
 0x37c   : > { %v684_v30 = vsel %vm569_vm4, %v679_v29, 0 }
 0x37d   : > { %1205 = vmatpush3.bf16.msra.mxu1 %v684_v30  ;;  %v789_v36 = vpack.c.bf16 %v788_v34, %v788_v34 }
 0x37e   : > { %1216 = vmatprep.subr.bf16.mxu1 %v1292_v1 }
 0x380   : > { %1207 = vmatmul.mubr.msk.bf16.vlgmr.msra.gmra.mrb[8].mxu1 %vm501_vm2, %v677_v16 }
 0x381   : > { %1217 = vmatpush3.bf16.msra.mxu1 %v796_v33  ;;  %1218 = vmatprep.mubr.msk.bf16.mxu1 %vm1293_vm0, %v1292_v1 }
 0x382   : > { %1228 = vmatprep.subr.bf16.mxu1 %v1292_v1  ;;  %v1283_v37 = vpop.eup %1282 }
 0x383   : > { %v900_v39 = vmul.f32 %v1283_v37, %v1275_v15 }
 0x385   : > { %v901_v40 = vpack.c.bf16 %v900_v39, %v900_v39 }
 0x388   : > { %1219 = vmatmul.mubr.msk.bf16.vlgmr.msra.gmra.mrb[12].mxu1 %vm501_vm2, %v789_v36 }
 0x389   : > { %1229 = vmatpush3.bf16.msra.mxu1 %v908_v38  ;;  %1230 = vmatprep.mubr.msk.bf16.mxu1 %vm1293_vm0, %v1292_v1 }
 0x390   : > { %1231 = vmatmul.mubr.msk.bf16.vlgmr.msra.gmra.mrb[16].mxu1 %vm501_vm2, %v901_v40 }
 0x3d8   : > { %v607_v41 = vpop.f32.mrb[4].mxu1 }
 0x3d9   : > { %v1196_v42 = vpop.f32.mrb[5].mxu1 }
 0x3da   : > { %v610_v43 = vpop.f32.mrb[6].mxu1 }
 0x3db   : > { %v1197_v44 = vpop.f32.mrb[7].mxu1 }
 0x453   : > { %v720_v46 = vpop.f32.mrb[8].mxu1 }
 0x454   : > { %951 = vrot.lane.b32.xlu0 %v720_v46, %s1301_s24  ;;  %v1208_v47 = vpop.f32.mrb[9].mxu1 }
 0x455   : > { %v723_v48 = vpop.f32.mrb[10].mxu1 }
 0x456   : > { %v1209_v49 = vpop.f32.mrb[11].mxu1 }
 0x45b   : > { %v832_v51 = vpop.f32.mrb[12].mxu1 }
 0x45c   : > { %955 = vrot.lane.b32.xlu1 %v832_v51, %s1302_s27  ;;  %v1220_v52 = vpop.f32.mrb[13].mxu1 }
 0x45d   : > { %v835_v53 = vpop.f32.mrb[14].mxu1 }
 0x45e   : > { %v1221_v54 = vpop.f32.mrb[15].mxu1 }
 0x463   : > { %v944_v55 = vpop.f32.mrb[16].mxu1 }
 0x464   : > { %959 = vrot.lane.b32.xlu0 %v944_v55, %s1303_s28  ;;  %v1232_v1 = vpop.f32.mrb[17].mxu1 }
 0x465   : > { %v947_v56 = vpop.f32.mrb[18].mxu1 }
 0x466   : > { %v1233_v57 = vpop.f32.mrb[19].mxu1 }
 0x4c6   : > { %v952_v58 = vpop.permute.xlu0 %951 }
 0x4c7   : > { %v962_v60 = vsel %vm501_vm2, %v607_v41, %v952_v58 }
 0x4ce   : > { %v956_v59 = vpop.permute.xlu1 %955 }
 0x4cf   : > { %v964_v61 = vsel %vm963_vm5, %v962_v60, %v956_v59 }
 0x4d6   : > { %v960_v62 = vpop.permute.xlu0 %959 }
 0x4d7   : > { %v966_v63 = vsel %vm965_vm6, %v964_v61, %v960_v62 }
 0x4d8   : > { %v967_v0 = vpack.c.bf16 %v966_v63, %v966_v63 }
 0x4da   : > { %1239 = vmatmul.mubr.msk.bf16.vlgmr.msra.gmra.mrb[20].mxu0 %vm389_vm1, %v967_v0 }
 0x5ad   : > { %v1028_v3 = vpop.f32.mrb[20].mxu0 }
 0x5ae   : > { %v1029_v4 = vadd.f32 %v1139_v2, %v1028_v3  ;;  %v1240_v5 = vpop.f32.mrb[21].mxu0 }
 0x5af   : > { %v1031_v6 = vpop.f32.mrb[22].mxu0 }
 0x5b0   : > { %v1034_v7 = vpack.c.bf16 %v1029_v4, %v1029_v4  ;;  %v1241_v8 = vpop.f32.mrb[23].mxu0 }
 0x5b2   : > { %1036 = vst.msk [vmem:[%s361_s14] sm:$0xf] %vm1035_vm7, %v1034_v7 }
 0x5b3 PF: > { %s19_s30 = sadd.s32 1, %s1290_s30  }
 0x5b4   : > { %p16_p4 = scmp.ge.s32.totalorder %s19_s30, 4  }
 0x5b6   :  { %18 = sbr.rel (!%p16_p4) target bundleno = 1 (0x1), region = 92 }

// kernel: decoder_layer.5
= control target key start
LH: loop header
LB: loop body
LE: loop exit
PB: predicated region body
PF: predicated region fallthrough
CT: control target
= control target key end

     0   :  { %v277_v1 = vmov 0.0   ;;  %vm278_vm0 = vmmov 0   ;;  %vm52_vm1 = vcmask 261120   ;;  %s354_s0 = inlined_call_operand.vmem [shape: bf16[16,32], index: 0, kind: input, shape index: {}]   ;;  %s355_s1 = inlined_call_operand.vmem [shape: bf16[32,64], index: 1, kind: input, shape index: {}]   ;;  %s356_s2 = inlined_call_operand.vmem [shape: f32[1,64], index: 2, kind: input, shape index: {}]   ;;  %s357_s3 = inlined_call_operand.vmem [shape: bf16[64,32], index: 3, kind: input, shape index: {}]   ;;  %s358_s4 = inlined_call_operand.vmem [shape: f32[1,32], index: 4, kind: input, shape index: {}]   ;;  %s359_s5 = inlined_call_operand.hbm [shape: f32[16,32], index: 5, kind: output, shape index: {}]  }
   0x1   :  { %v246_v0 = vld [vmem:[%s355_s1] sm:$0xff]   ;;  %221 = vmatprep.subr.bf16.mxu0 %v277_v1  ;;  %229 = vmatprep.subr.bf16.mxu1 %v277_v1  ;;  %v247_v2 = vld [vmem:[%s355_s1 + $0x8] sm:$0xff]  }
   0x2   :  { %222 = vmatpush3.bf16.msra.mxu0 %v246_v0  ;;  %225 = vmatprep.mubr.msk.bf16.mxu0 %vm278_vm0, %v277_v1  ;;  %v249_v3 = vld [vmem:[%s357_s3] sm:$0xff]   ;;  %v250_v5 = vld [vmem:[%s357_s3 + $0x8] sm:$0xff]  }
   0x3   :  { %223 = vmatprep.subr.bf16.mxu0 %v277_v1  ;;  %237 = vmatprep.mubr.msk.bf16.mxu1 %vm278_vm0, %v277_v1  ;;  %v248_v4 = vld [vmem:[%s354_s0] sm:$0xff]  }
   0x4   :  { %230 = vmatpush3.bf16.msra.mxu1 %v249_v3 }
   0x5   :  { %231 = vmatprep.subr.bf16.mxu1 %v277_v1 }
   0x6   :  { %224 = vmatpush3.bf16.msra.mxu0 %v247_v2 }
   0x7   :  { %10 = vsyncpa [#allocation3], 0  ;;  %v251_v6 = vld [vmem:[%s357_s3 + $0x10] sm:$0xff]   ;;  %v252_v7 = vld [vmem:[%s357_s3 + $0x18] sm:$0xff]   ;;  %vm139_vm2 = vcmask 523264   ;;  %s279_s3 = smov [#allocation2]  }
   0x8   :  { %232 = vmatpush3.bf16.msra.mxu1 %v250_v5  ;;  %v202_v8 = vld [vmem:[%s356_s2] ss:$0 sm:$0xff]  ;;  %s191_s9 = sshll.u32 %s279_s3, 4  ;;  %s192_s9 = int_to_ptr.vmem [resolvable:$true] %s191_s9 }
   0x9   :  { %226 = vmatmul.mubr.msk.bf16.vlgmr.msra.gmra.mrb[0].mxu0 %vm52_vm1, %v248_v4  ;;  %233 = vmatprep.subr.bf16.mxu1 %v277_v1  ;;  %v207_v18 = vld [vmem:[%s358_s4] ss:$0 sm:$0xff]  ;;  %s253_s2 = scalar_lea.vmem %s192_s9, 256  ;;  %p258_p1 = scmp.lt.s32.totalorder %s192_s9, %s192_s9 }
   0xa   :  { %p254_p0 = scmp.ne.s32.totalorder %s192_s9, %s253_s2  ;;  %p259_p2 = scmp.lt.s32.totalorder %s253_s2, %s253_s2 }
   0xc   :  { %234 = vmatpush3.bf16.msra.mxu1 %v251_v6  ;;  %p260_p3 = por %p259_p2, %p258_p1 }
   0xd   :  { %235 = vmatprep.subr.bf16.mxu1 %v277_v1 }
   0xe   :  { %p261_p4 = pnand %p260_p3, %p254_p0 }
  0x10   :  { %236 = vmatpush3.bf16.msra.mxu1 %v252_v7 }
  0xdc   :  { %v90_v9 = vpop.f32.mrb[0].mxu0 }
  0xdd   :  { %v91_v10 = vadd.f32 %v202_v8, %v90_v9  ;;  %v227_v11 = vpop.f32.mrb[1].mxu0 }
  0xde   :  { %v93_v12 = vpop.f32.mrb[2].mxu0 }
  0xdf   :  { %v94_v13 = vadd.f32 %v202_v8, %v93_v12  ;;  %v228_v14 = vpop.f32.mrb[3].mxu0  ;;  %v97_v15 = vmax.f32 %v91_v10, 0.0 }
  0xe1   :  { %v98_v16 = vmax.f32 %v94_v13, 0.0 }
  0xe3   :  { %v99_v17 = vpack.c.bf16 %v98_v16, %v97_v15 }
  0xe5   :  { %238 = vmatmul.mubr.msk.bf16.vlgmr.msra.gmra.mrb[0].mxu1 %vm139_vm2, %v99_v17 }
 0x1b8   :  { %v177_v19 = vpop.f32.mrb[0].mxu1 }
 0x1b9   :  { %v178_v20 = vadd.f32 %v207_v18, %v177_v19  ;;  %v239_v21 = vpop.f32.mrb[1].mxu1 }
 0x1ba   :  { %v180_v22 = vpop.f32.mrb[2].mxu1 }
 0x1bb   :  { %184 = vst.msk [vmem:[#allocation2] sm:$0xff] %vm52_vm1, %v178_v20  ;;  %v181_v23 = vadd.f32 %v207_v18, %v180_v22  ;;  %v240_v24 = vpop.f32.mrb[3].mxu1 }
 0x1bd   :  { %185 = vst.msk [vmem:[#allocation2 + $0x8] sm:$0xff] %vm52_vm1, %v181_v23 }
 0x1be   :  { %264 = shalt.err (!%p261_p4)
}
 0x1bf   :  { %s265_s11 = scalar_lea.hbm %s359_s5, 256 }
 0x1c0   :  { %p266_p5 = scmp.ne.s32.totalorder %s359_s5, %s265_s11  ;;  %p269_p6 = scmp.lt.u32.totalorder %s265_s11, %s359_s5 }
 0x1c2   :  { %p271_p7 = pnand %p269_p6, %p266_p5 }
 0x1c4   :  { %274 = shalt.err (!%p271_p7)
}
 0x1c5   :  { %s280_s16 = smov 128   ;;  %s281_s17 = smov 8  }
 0x1c6   :  { %197 = dma.vmem_to_hbm [thread:$0]  %s192_s9, 256, %s359_s5, [#allocation3], %s280_s16, %s280_s16, %s281_s17  }
 0x1c7   :  { %275 = dma.done.wait [#allocation3], 256  }
 0x1c8   :  { %276 = vsyncadd [#allocation3], 4294967040 }
 0x1c9   :  { %201 = vsyncpa [#allocation3], 1 }

// kernel: decoder_layer.3
= control target key start
LH: loop header
LB: loop body
LE: loop exit
PB: predicated region body
PF: predicated region fallthrough
CT: control target
= control target key end

     0   :  { %14 = vsyncpa [#allocation3], 0  ;;  %s1702_s0 = inlined_call_operand.vmem [shape: bf16[2,8,32], index: 0, kind: input, shape index: {}, may-alias: {0,1}]   ;;  %s1703_s1 = inlined_call_operand.vmem [shape: bf16[2,8,32], index: 1, kind: input, shape index: {}, may-alias: {0,1}]   ;;  %s1704_s2 = inlined_call_operand.vmem [shape: f32[2,1,8,8], index: 2, kind: input, shape index: {}]   ;;  %s1705_s3 = inlined_call_operand.vmem [shape: bf16[32,32], index: 3, kind: input, shape index: {}]   ;;  %s1706_s4 = inlined_call_operand.vmem [shape: f32[1,32], index: 4, kind: input, shape index: {}]   ;;  %s1707_s5 = inlined_call_operand.hbm [shape: bf16[32,64], index: 5, kind: input, shape index: {}]   ;;  %s1708_s6 = inlined_call_operand.vmem [shape: f32[1,64], index: 6, kind: input, shape index: {}]   ;;  %s1709_s7 = inlined_call_operand.hbm [shape: bf16[32,32], index: 7, kind: input, shape index: {}]   ;;  %s1710_s8 = inlined_call_operand.vmem [shape: f32[1,32], index: 8, kind: input, shape index: {}]   ;;  %s1711_s9 = inlined_call_operand.vmem [shape: bf16[2,8,32], index: 9, kind: output, shape index: {}]  }
   0x1   :  { %15 = vsyncpa [#allocation5], 0  ;;  %s1501_s30 = smov 0  }
   0x2 LB: > { %s1507_s10 = sadd.s32 4294967295, %s1433_s30   ;;  %p1168_p0 = scmp.ge.s32.totalorder %s1433_s30, 1  ;;  %s1433_s30 = sphi %s1501_s30, %s21_s30  }
   0x3   : > { %p256_p1 = scmp.lt.s32.totalorder %s1433_s30, 3  ;;  %s1435_s11 = smov [#allocation2]  }
   0x4   : > { %s274_s12 = sshll.u32 %s1435_s11, 4  ;;  %p1712_p3 = scmp.eq.s32.totalorder %s1507_s10, 0  ;;  %s275_s12 = int_to_ptr.vmem [resolvable:$true] %s274_s12 }
   0x5   : > { %p1511_p2 = pnand %p1168_p0, %p256_p1  ;;  %s1436_s14 = smov [#allocation4]  }
   0x6   : > { %s290_s15 = sshll.u32 %s1436_s14, 4  ;;  %s1363_s19 = scalar_lea.hbm %s1707_s5, 256  ;;  %s1524_s15 = int_to_ptr.vmem [resolvable:$true] %s290_s15 }
   0x7   : > { %s1714_s13 = scalar_select %p1511_p2, 1, 0 }
   0x8   : > { %p1306_p4 = pneg %p1511_p2  ;;  %p1364_p6 = scmp.ne.s32.totalorder %s1707_s5, %s1363_s19 }
   0x9   : > { %p1370_p10 = scmp.lt.u32.totalorder %s1363_s19, %s1707_s5 }
   0xa   : > { %p1520_p5 = pnand %p1712_p3, %p1306_p4 }
   0xc   : > { %p1365_p7 = pneg %p1520_p5 }
   0xe   : > { %p1366_p8 = pnand %p1365_p7, %p1364_p6 }
  0x10   : > { %p1367_p9 = pneg %p1366_p8 }
  0x12   : > { %p1372_p11 = pnand %p1370_p10, %p1367_p9 }
  0x14   : > { %1375 = shalt.err (!%p1372_p11)
}
  0x15   : > { %s1376_s24 = scalar_lea.vmem %s275_s12, 256  ;;  %p1384_p1 = scmp.lt.s32.totalorder %s275_s12, %s275_s12 }
  0x16   : > { %p1377_p12 = scmp.ne.s32.totalorder %s275_s12, %s1376_s24  ;;  %p1385_p4 = scmp.lt.s32.totalorder %s1376_s24, %s1376_s24 }
  0x18   : > { %p1379_p13 = pnand %p1377_p12, %p1365_p7  ;;  %p1386_p3 = por %p1385_p4, %p1384_p1 }
  0x1a   : > { %p1380_p0 = pneg %p1379_p13 }
  0x1c   : > { %p1387_p2 = pnand %p1386_p3, %p1380_p0 }
  0x1e   : > { %1390 = shalt.err (!%p1387_p2)
}
  0x1f   : > { %s1437_s25 = smov 64   ;;  %s1438_s26 = smov 4  }
  0x20   : > { %1309 = dma.hbm_to_vmem [thread:$0]  (!%p1520_p5), %s1707_s5, 256, %s275_s12, [#allocation3], %s1437_s25, %s1437_s25, %s1438_s26  }
  0x21   : > { %s1391_s14 = scalar_lea.hbm %s1709_s7, 256 }
  0x22   : > { %p1392_p6 = scmp.ne.s32.totalorder %s1709_s7, %s1391_s14  ;;  %p1398_p8 = scmp.lt.u32.totalorder %s1391_s14, %s1709_s7 }
  0x24   : > { %p1394_p2 = pnand %p1392_p6, %p1365_p7 }
  0x26   : > { %p1395_p3 = pneg %p1394_p2 }
  0x28   : > { %p1400_p9 = pnand %p1398_p8, %p1395_p3 }
  0x2a   : > { %1403 = shalt.err (!%p1400_p9)
}
  0x2b   : > { %s1404_s12 = scalar_lea.vmem %s1524_s15, 256  ;;  %p1412_p13 = scmp.lt.s32.totalorder %s1524_s15, %s1524_s15 }
  0x2c   : > { %p1405_p10 = scmp.ne.s32.totalorder %s1524_s15, %s1404_s12  ;;  %p1413_p0 = scmp.lt.s32.totalorder %s1404_s12, %s1404_s12 }
  0x2e   : > { %p1407_p11 = pnand %p1405_p10, %p1365_p7  ;;  %p1414_p1 = por %p1413_p0, %p1412_p13 }
  0x30   : > { %p1408_p12 = pneg %p1407_p11 }
  0x32   : > { %p1415_p4 = pnand %p1414_p1, %p1408_p12 }
  0x34   : > { %1418 = shalt.err (!%p1415_p4)
}
  0x35   : > { %1312 = dma.hbm_to_vmem [thread:$0]  (!%p1520_p5), %s1709_s7, 256, %s1524_s15, [#allocation5], %s1437_s25, %s1437_s25, %s1438_s26  }
  0x36   : > { %p1716_p6 = scmp.ne.s32.totalorder %s1714_s13, 0 }
  0x37   : > { %p1717_p2 = scmp.eq.s32.totalorder (!%p1716_p6), %s1507_s10, 0 }
  0x38   : > { %330 = sbr.rel (%p1716_p6) target bundleno = 1519 (0x5ef), region = 56 }
  0x3f   : > { %1424 = dma.done.wait (%p1717_p2), [#allocation3], 256   ;;  %p1718_p7 = pmov %p1717_p2 }
  0x40   : > { %p1719_p3 = pmov %p1717_p2 }
  0x41   : > { %1426 = vsyncadd (%p1718_p7), [#allocation3], 4294967040 }
  0x42   : > { %1428 = dma.done.wait (%p1719_p3), [#allocation5], 256   ;;  %p1720_p8 = pmov %p1717_p2 }
  0x43   : > { %p376_p9 = scmp.lt.s32.totalorder %s1507_s10, 1  ;;  %v1439_v0 = vmov 0.0   ;;  %vm1440_vm0 = vmmov 0   ;;  %v1341_v1 = vld [vmem:[#allocation2] sm:$0xff]   ;;  %v1343_v3 = vld [vmem:[#allocation2 + $0x8] sm:$0xff]   ;;  %vm419_vm1 = vcmask 261120  }
  0x44   : > { %1430 = vsyncadd (%p1720_p8), [#allocation5], 4294967040  ;;  %1234 = vmatprep.subr.bf16.mxu1 %v1439_v0  ;;  %1226 = vmatprep.subr.bf16.mxu0 %v1439_v0  ;;  %v1342_v2 = vld [vmem:[%s1705_s3] sm:$0xff]   ;;  %v1344_v4 = vld [vmem:[%s1705_s3 + $0x8] sm:$0xff]   ;;  %vm531_vm2 = vcmask 64512   ;;  %s1441_s20 = smov 112  }
  0x45   : > { %1238 = vmatprep.mubr.msk.bf16.mxu1 %vm1440_vm0, %v1439_v0  ;;  %1230 = vmatprep.mubr.msk.bf16.mxu0 %vm1440_vm0, %v1439_v0  ;;  %s1722_s10 = smov (!%p376_p9, %s1507_s10), 1  ;;  %v1183_v7 = vld [vmem:[%s1708_s6] ss:$0 sm:$0xff]  ;;  %s1442_s12 = smov 120   ;;  %vm599_vm4 = vcmask 1043456   ;;  %vm993_vm5 = vcmask 130048  }
  0x46   : > { %s1594_s13 = sshll.u32 %s1722_s10, 2  ;;  %1235 = vmatpush3.bf16.msra.mxu1 %v1341_v1  ;;  %1227 = vmatpush3.bf16.msra.mxu0 %v1342_v2  ;;  %v1179_v8 = vld [vmem:[%s1706_s4] ss:$0 sm:$0xff]  ;;  %s1443_s21 = smov 104   ;;  %vm995_vm6 = vcmask 195584   ;;  %vm1065_vm7 = vcmask 257024  }
  0x47   : > { %1236 = vmatprep.subr.bf16.mxu1 %v1439_v0  ;;  %s383_s25 = scalar_lea.vmem %s1703_s1, %s1594_s13  ;;  %1228 = vmatprep.subr.bf16.mxu0 %v1439_v0  ;;  %s379_s11 = scalar_lea.vmem %s1702_s0, %s1594_s13 }
  0x48   : > { %v394_v5 = vld [vmem:[%s383_s25] sm:$0xf]  ;;  %s1177_s22 = sshll.u32 %s1722_s10, 3  ;;  %s1444_s10 = smov 96  }
  0x49   : > { %v393_v6 = vld [vmem:[%s379_s11] sm:$0xf]  ;;  %s387_s23 = scalar_lea.vmem %s1704_s2, %s1177_s22  ;;  %s1445_s24 = smov 80  }
  0x4a   : > { %1237 = vmatpush3.bf16.msra.mxu1 %v1343_v3  ;;  %1229 = vmatpush3.bf16.msra.mxu0 %v1344_v4  ;;  %v395_v31 = vld [vmem:[%s387_s23] sm:$0xff]  ;;  %s1446_s25 = smov 72   ;;  %s1447_s26 = smov 88  }
  0x4b   : > { %1248 = vmatprep.subr.bf16.mxu1 %v1439_v0  ;;  %1242 = vmatprep.subr.bf16.mxu0 %v1439_v0  ;;  %vm579_vm3 = vcmp.gt.f32.partialorder %v395_v31, 0.0  ;;  %s1448_s27 = smov 8   ;;  %s1449_s28 = smov 16  }
  0x4c   : > { %s1450_s29 = smov 24   ;;  %s391_s19 = scalar_lea.vmem %s1711_s9, %s1594_s13 }
  0x4d   : > { %1239 = vmatmul.mubr.msk.bf16.vlgmr.msra.gmra.mrb[0].mxu1 %vm419_vm1, %v394_v5  ;;  %1231 = vmatmul.mubr.msk.bf16.vlgmr.msra.gmra.mrb[0].mxu0 %vm419_vm1, %v393_v6 }
  0x4e   : > { %1250 = vmatprep.mubr.msk.bf16.mxu1 %vm1440_vm0, %v1439_v0  ;;  %1244 = vmatprep.mubr.msk.bf16.mxu0 %vm1440_vm0, %v1439_v0 }
 0x120   : > { %v523_v9 = vpop.f32.mrb[0].mxu1  ;;  %v457_v12 = vpop.f32.mrb[0].mxu0 }
 0x121   : > { %v524_v10 = vadd.f32 %v1183_v7, %v523_v9  ;;  %v1240_v11 = vpop.f32.mrb[1].mxu1  ;;  %v458_v14 = vadd.f32 %v1179_v8, %v457_v12  ;;  %v1232_v15 = vpop.f32.mrb[1].mxu0 }
 0x122   : > { %v526_v13 = vpop.f32.mrb[2].mxu1  ;;  %v460_v18 = vpop.f32.mrb[2].mxu0 }
 0x123   : > { %v1626_v16 = vpack.c.bf16 %v524_v10, %v524_v10  ;;  %v1241_v17 = vpop.f32.mrb[3].mxu1  ;;  %v1233_v19 = vpop.f32.mrb[3].mxu0  ;;  %v529_v20 = vpack.c.bf16 %v458_v14, %v458_v14 }
 0x125   : > { %758 = vrot.lane.b32.xlu1 %v1626_v16, %s1441_s20  ;;  %646 = vrot.lane.b32.xlu0 %v1626_v16, %s1442_s12  ;;  %v536_v21 = vsel %vm531_vm2, %v1626_v16, 0 }
 0x126   : > { %1243 = vmatpush3.bf16.xpose.msra.mxu0 %v536_v21 }
 0x127   : > { %1254 = vmatprep.subr.bf16.mxu0 %v1439_v0 }
 0x129   : > { %756 = vrot.lane.b32.xlu1 %v529_v20, %s1441_s20  ;;  %644 = vrot.lane.b32.xlu0 %v529_v20, %s1442_s12 }
 0x12d   : > { %868 = vrot.lane.b32.xlu1 %v529_v20, %s1443_s21  ;;  %870 = vrot.lane.b32.xlu0 %v1626_v16, %s1443_s21 }
 0x12e   : > { %1245 = vmatmul.mubr.msk.bf16.vlgmr.msra.gmra.mrb[4].mxu0 %vm531_vm2, %v529_v20 }
 0x12f   : > { %1256 = vmatprep.mubr.msk.bf16.mxu0 %vm1440_vm0, %v1439_v0 }
 0x197   : > { %v647_v22 = vpop.permute.xlu0 %646  ;;  %v759_v24 = vpop.permute.xlu1 %758 }
 0x198   : > { %v652_v23 = vsel %vm531_vm2, %v647_v22, 0  ;;  %v764_v26 = vsel %vm531_vm2, %v759_v24, 0 }
 0x199   : > { %1255 = vmatpush3.bf16.xpose.msra.mxu0 %v652_v23 }
 0x19a   : > { %1266 = vmatprep.subr.bf16.mxu0 %v1439_v0 }
 0x19b   : > { %v645_v25 = vpop.permute.xlu0 %644  ;;  %v757_v28 = vpop.permute.xlu1 %756 }
 0x19f   : > { %v871_v27 = vpop.permute.xlu0 %870  ;;  %v869_v30 = vpop.permute.xlu1 %868 }
 0x1a0   : > { %1257 = vmatmul.mubr.msk.bf16.vlgmr.msra.gmra.mrb[8].mxu0 %vm531_vm2, %v645_v25  ;;  %v876_v29 = vsel %vm531_vm2, %v871_v27, 0 }
 0x1a1   : > { %1267 = vmatpush3.bf16.xpose.msra.mxu0 %v764_v26  ;;  %1268 = vmatprep.mubr.msk.bf16.mxu0 %vm1440_vm0, %v1439_v0 }
 0x1a2   : > { %1278 = vmatprep.subr.bf16.mxu0 %v1439_v0 }
 0x1a8   : > { %1269 = vmatmul.mubr.msk.bf16.vlgmr.msra.gmra.mrb[12].mxu0 %vm531_vm2, %v757_v28 }
 0x1a9   : > { %1279 = vmatpush3.bf16.xpose.msra.mxu0 %v876_v29  ;;  %1280 = vmatprep.mubr.msk.bf16.mxu0 %vm1440_vm0, %v1439_v0 }
 0x1aa   : > { %1290 = vmatprep.subr.bf16.mxu0 %v1439_v0 }
 0x1b0   : > { %1281 = vmatmul.mubr.msk.bf16.vlgmr.msra.gmra.mrb[16].mxu0 %vm531_vm2, %v869_v30 }
 0x1b1   : > { %1294 = vmatprep.mubr.msk.bf16.mxu0 %vm1440_vm0, %v1439_v0 }
 0x201   : > { %v572_v32 = vpop.f32.mrb[4].mxu0 }
 0x202   : > { %v578_v33 = vmul.f32 0.35355338, %v572_v32  ;;  %v1246_v34 = vpop.f32.mrb[5].mxu0 }
 0x203   : > { %v575_v35 = vpop.f32.mrb[6].mxu0 }
 0x204   : > { %v1247_v36 = vpop.f32.mrb[7].mxu0  ;;  %v580_v37 = vsel %vm579_vm3, %v578_v33, -1e+09 }
 0x205   : > { %v581_v38 = vsel %vm531_vm2, %v580_v37, -inf }
 0x206   : > { %582 = vmax.xlane.f32.xlu0 %v581_v38 }
 0x273   : > { %v688_v39 = vpop.f32.mrb[8].mxu0 }
 0x274   : > { %v694_v40 = vmul.f32 0.35355338, %v688_v39  ;;  %v1258_v41 = vpop.f32.mrb[9].mxu0 }
 0x275   : > { %v691_v42 = vpop.f32.mrb[10].mxu0 }
 0x276   : > { %v1259_v43 = vpop.f32.mrb[11].mxu0  ;;  %v695_v44 = vsel %vm579_vm3, %v694_v40, -1e+09 }
 0x277   : > { %v696_v45 = vsel %vm531_vm2, %v695_v44, -inf }
 0x278   : > { %697 = vmax.xlane.f32.xlu1 %v696_v45  ;;  %v1345_v45 = vld [vmem:[#allocation4] sm:$0xff]  }
 0x279   : > { %1291 = vmatpush3.bf16.msra.mxu0 %v1345_v45 }
 0x27a   : > { %1292 = vmatprep.subr.bf16.mxu0 %v1439_v0 }
 0x27b   : > { %v800_v46 = vpop.f32.mrb[12].mxu0 }
 0x27c   : > { %v806_v47 = vmul.f32 0.35355338, %v800_v46  ;;  %v1270_v48 = vpop.f32.mrb[13].mxu0 }
 0x27d   : > { %v803_v49 = vpop.f32.mrb[14].mxu0 }
 0x27e   : > { %v1271_v50 = vpop.f32.mrb[15].mxu0  ;;  %v807_v51 = vsel %vm579_vm3, %v806_v47, -1e+09 }
 0x27f   : > { %v808_v52 = vsel %vm531_vm2, %v807_v51, -inf  ;;  %v1346_v50 = vld [vmem:[#allocation4 + $0x8] sm:$0xff]  }
 0x280   : > { %809 = vmax.xlane.f32.xlu0 %v808_v52  ;;  %1293 = vmatpush3.bf16.msra.mxu0 %v1346_v50 }
 0x283   : > { %v912_v53 = vpop.f32.mrb[16].mxu0 }
 0x284   : > { %v918_v54 = vmul.f32 0.35355338, %v912_v53  ;;  %v1282_v55 = vpop.f32.mrb[17].mxu0 }
 0x285   : > { %v915_v56 = vpop.f32.mrb[18].mxu0 }
 0x286   : > { %v1283_v57 = vpop.f32.mrb[19].mxu0  ;;  %v919_v58 = vsel %vm579_vm3, %v918_v54, -1e+09 }
 0x287   : > { %v920_v59 = vsel %vm531_vm2, %v919_v58, -inf }
 0x288   : > { %921 = vmax.xlane.f32.xlu0 %v920_v59 }
 0x293   : > { %v583_v60 = vpop.xlane.xlu0 %582 }
 0x294   : > { %v584_v61 = vsub.f32 %v580_v37, %v583_v60 }
 0x296   : > { %v585_v62 = vmul.f32 1.442695, %v584_v61 }
 0x298   : > { %1347 = vpow2.f32 %v585_v62 }
 0x2a2   : > { %v1348_v63 = vpop.eup %1347 }
 0x2a3   : > { %v587_v1 = vsel %vm531_vm2, %v1348_v63, 0.0 }
 0x2a4   : > { %588 = vadd.xlane.f32.xlu1 %v587_v1 }
 0x2b5   : > { %594 = vrot.lane.b32.xlu1 %v1626_v16, %s1444_s10 }
 0x305   : > { %v698_v2 = vpop.xlane.xlu1 %697 }
 0x306   : > { %v699_v3 = vsub.f32 %v695_v44, %v698_v2  ;;  %v1195_v2 = vld [vmem:[%s1710_s8] ss:$0 sm:$0xff] }
 0x308   : > { %v700_v4 = vmul.f32 1.442695, %v699_v3 }
 0x30a   : > { %1349 = vpow2.f32 %v700_v4 }
 0x30d   : > { %v810_v5 = vpop.xlane.xlu0 %809 }
 0x30e   : > { %v811_v6 = vsub.f32 %v807_v51, %v810_v5 }
 0x310   : > { %v812_v7 = vmul.f32 1.442695, %v811_v6 }
 0x312   : > { %1351 = vpow2.f32 %v812_v7 }
 0x314   : > { %v1350_v8 = vpop.eup %1349 }
 0x315   : > { %v922_v9 = vpop.xlane.xlu0 %921  ;;  %v702_v10 = vsel %vm531_vm2, %v1350_v8, 0.0 }
 0x316   : > { %v923_v11 = vsub.f32 %v919_v58, %v922_v9  ;;  %703 = vadd.xlane.f32.xlu0 %v702_v10 }
 0x318   : > { %v924_v12 = vmul.f32 1.442695, %v923_v11 }
 0x31a   : > { %1353 = vpow2.f32 %v924_v12 }
 0x31c   : > { %v1352_v13 = vpop.eup %1351 }
 0x31d   : > { %v814_v14 = vsel %vm531_vm2, %v1352_v13, 0.0 }
 0x31e   : > { %815 = vadd.xlane.f32.xlu1 %v814_v14 }
 0x324   : > { %v1354_v15 = vpop.eup %1353 }
 0x325   : > { %v926_v17 = vsel %vm531_vm2, %v1354_v15, 0.0 }
 0x326   : > { %927 = vadd.xlane.f32.xlu0 %v926_v17 }
 0x32f   : > { %820 = vrot.lane.b32.xlu1 %v1626_v16, %s1445_s24 }
 0x331   : > { %v589_v18 = vpop.xlane.xlu1 %588 }
 0x332   : > { %1355 = vrcp.f32 %v589_v18 }
 0x333   : > { %932 = vrot.lane.b32.xlu1 %v1626_v16, %s1446_s25 }
 0x335   : > { %v595_v19 = vpop.permute.xlu1 %594 }
 0x336   : > { %v601_v20 = vsel %vm599_vm4, %v595_v19, 0 }
 0x337   : > { %1249 = vmatpush3.bf16.msra.mxu1 %v601_v20 }
 0x338   : > { %1260 = vmatprep.subr.bf16.mxu1 %v1439_v0 }
 0x33c   : > { %v1356_v21 = vpop.eup %1355  ;;  %708 = vrot.lane.b32.xlu0 %v1626_v16, %s1447_s26 }
 0x33d   : > { %v591_v22 = vmul.f32 %v1356_v21, %v1348_v63 }
 0x33f   : > { %v592_v23 = vpack.c.bf16 %v591_v22, %v591_v22 }
 0x341   : > { %1251 = vmatmul.mubr.msk.bf16.vlgmr.msra.gmra.mrb[4].mxu1 %vm531_vm2, %v592_v23 }
 0x342   : > { %1262 = vmatprep.mubr.msk.bf16.mxu1 %vm1440_vm0, %v1439_v0 }
 0x3a3   : > { %v704_v24 = vpop.xlane.xlu0 %703 }
 0x3a4   : > { %1357 = vrcp.f32 %v704_v24 }
 0x3ab   : > { %v816_v25 = vpop.xlane.xlu1 %815 }
 0x3ac   : > { %1359 = vrcp.f32 %v816_v25 }
 0x3ae   : > { %v1358_v26 = vpop.eup %1357 }
 0x3af   : > { %v706_v28 = vmul.f32 %v1358_v26, %v1350_v8  ;;  %v821_v31 = vpop.permute.xlu1 %820 }
 0x3b0   : > { %v826_v33 = vsel %vm599_vm4, %v821_v31, 0 }
 0x3b1   : > { %v707_v16 = vpack.c.bf16 %v706_v28, %v706_v28 }
 0x3b3   : > { %v928_v27 = vpop.xlane.xlu0 %927  ;;  %v933_v35 = vpop.permute.xlu1 %932 }
 0x3b4   : > { %1361 = vrcp.f32 %v928_v27  ;;  %v938_v38 = vsel %vm599_vm4, %v933_v35, 0 }
 0x3b6   : > { %v1360_v32 = vpop.eup %1359 }
 0x3b7   : > { %v709_v29 = vpop.permute.xlu0 %708  ;;  %v818_v34 = vmul.f32 %v1360_v32, %v1352_v13 }
 0x3b8   : > { %v714_v30 = vsel %vm599_vm4, %v709_v29, 0 }
 0x3b9   : > { %1261 = vmatpush3.bf16.msra.mxu1 %v714_v30  ;;  %v819_v36 = vpack.c.bf16 %v818_v34, %v818_v34 }
 0x3ba   : > { %1272 = vmatprep.subr.bf16.mxu1 %v1439_v0 }
 0x3bc   : > { %1263 = vmatmul.mubr.msk.bf16.vlgmr.msra.gmra.mrb[8].mxu1 %vm531_vm2, %v707_v16 }
 0x3bd   : > { %1273 = vmatpush3.bf16.msra.mxu1 %v826_v33  ;;  %1274 = vmatprep.mubr.msk.bf16.mxu1 %vm1440_vm0, %v1439_v0 }
 0x3be   : > { %1284 = vmatprep.subr.bf16.mxu1 %v1439_v0  ;;  %v1362_v37 = vpop.eup %1361 }
 0x3bf   : > { %v930_v39 = vmul.f32 %v1362_v37, %v1354_v15 }
 0x3c1   : > { %v931_v40 = vpack.c.bf16 %v930_v39, %v930_v39 }
 0x3c4   : > { %1275 = vmatmul.mubr.msk.bf16.vlgmr.msra.gmra.mrb[12].mxu1 %vm531_vm2, %v819_v36 }
 0x3c5   : > { %1285 = vmatpush3.bf16.msra.mxu1 %v938_v38  ;;  %1286 = vmatprep.mubr.msk.bf16.mxu1 %vm1440_vm0, %v1439_v0 }
 0x3cc   : > { %1287 = vmatmul.mubr.msk.bf16.vlgmr.msra.gmra.mrb[16].mxu1 %vm531_vm2, %v931_v40 }
 0x414   : > { %v637_v41 = vpop.f32.mrb[4].mxu1 }
 0x415   : > { %v1252_v42 = vpop.f32.mrb[5].mxu1 }
 0x416   : > { %v640_v43 = vpop.f32.mrb[6].mxu1 }
 0x417   : > { %v1253_v44 = vpop.f32.mrb[7].mxu1 }
 0x48f   : > { %v750_v46 = vpop.f32.mrb[8].mxu1 }
 0x490   : > { %981 = vrot.lane.b32.xlu0 %v750_v46, %s1448_s27  ;;  %v1264_v47 = vpop.f32.mrb[9].mxu1 }
 0x491   : > { %v753_v48 = vpop.f32.mrb[10].mxu1 }
 0x492   : > { %v1265_v49 = vpop.f32.mrb[11].mxu1 }
 0x497   : > { %v862_v51 = vpop.f32.mrb[12].mxu1 }
 0x498   : > { %985 = vrot.lane.b32.xlu1 %v862_v51, %s1449_s28  ;;  %v1276_v52 = vpop.f32.mrb[13].mxu1 }
 0x499   : > { %v865_v53 = vpop.f32.mrb[14].mxu1 }
 0x49a   : > { %v1277_v54 = vpop.f32.mrb[15].mxu1 }
 0x49f   : > { %v974_v55 = vpop.f32.mrb[16].mxu1 }
 0x4a0   : > { %989 = vrot.lane.b32.xlu0 %v974_v55, %s1450_s29  ;;  %v1288_v56 = vpop.f32.mrb[17].mxu1 }
 0x4a1   : > { %v977_v57 = vpop.f32.mrb[18].mxu1 }
 0x4a2   : > { %v1289_v0 = vpop.f32.mrb[19].mxu1 }
 0x502   : > { %v982_v58 = vpop.permute.xlu0 %981 }
 0x503   : > { %v992_v60 = vsel %vm531_vm2, %v637_v41, %v982_v58 }
 0x50a   : > { %v986_v59 = vpop.permute.xlu1 %985 }
 0x50b   : > { %v994_v61 = vsel %vm993_vm5, %v992_v60, %v986_v59 }
 0x512   : > { %v990_v62 = vpop.permute.xlu0 %989 }
 0x513   : > { %v996_v63 = vsel %vm995_vm6, %v994_v61, %v990_v62 }
 0x514   : > { %v997_v1 = vpack.c.bf16 %v996_v63, %v996_v63 }
 0x516   : > { %1295 = vmatmul.mubr.msk.bf16.vlgmr.msra.gmra.mrb[20].mxu0 %vm419_vm1, %v997_v1 }
 0x5e9   : > { %v1058_v3 = vpop.f32.mrb[20].mxu0 }
 0x5ea   : > { %v1059_v4 = vadd.f32 %v1195_v2, %v1058_v3  ;;  %v1296_v5 = vpop.f32.mrb[21].mxu0 }
 0x5eb   : > { %v1061_v6 = vpop.f32.mrb[22].mxu0 }
 0x5ec   : > { %v1064_v7 = vpack.c.bf16 %v1059_v4, %v1059_v4  ;;  %v1297_v8 = vpop.f32.mrb[23].mxu0 }
 0x5ee   : > { %1066 = vst.msk [vmem:[%s391_s19] sm:$0xf] %vm1065_vm7, %v1064_v7 }
 0x5ef PF: > { %s21_s30 = sadd.s32 1, %s1433_s30  }
 0x5f0   : > { %p18_p5 = scmp.ge.s32.totalorder %s21_s30, 4  }
 0x5f2   :  { %20 = sbr.rel (!%p18_p5) target bundleno = 2 (0x2), region = 101 }
 0x5f9   :  { %1086 = vsyncpa [#allocation3], 1 }
 0x5fa   :  { %1088 = vsyncpa [#allocation3 + $0x1], 1 }
 0x5fb   :  { %1089 = vsyncpa [#allocation5], 1 }

</bundles_post_ra>
